<compile_context>
chip_gen: v5e
topology: v5e:2x2
jax: 0.10.0
libtpu: 0.0.40
codegen_flags: <defaults>
</compile_context>

<pallas_src>
import math
import jax
import jax.numpy as jnp
from jax.experimental import pallas as pl
from jax.experimental.pallas import tpu as pltpu

# Model hyper-parameters (consistent with the module defaults heads=8, num_layers=2)
B, S, D = 2, 8, 32
HEADS = 8
NUM_LAYERS = 2
D_K = D // HEADS
LN_EPS = 1e-5
NEG_INF = -1000000000.0  # matches masked_fill(-1e9) in the reference


def _transformer_kernel(x_ref, bias_ref, ln_w_ref, ln_b_ref, wqkv_ref, wo_ref, out_ref):
    # x_ref:    [R, D]     rows = (batch, seq) flattened for this grid step
    # bias_ref: [R, R]     additive attention bias (0 = keep, -1e9 = masked);
    #                      cross-batch entries are pre-masked when R > S.
    # ln_w/b:   [L, 1, D]
    # wqkv:     [L, D, 3D] already [in, out]; q-columns pre-scaled by 1/sqrt(d_k)
    # wo:       [L, D, D]  already [in, out]
    x = x_ref[...]                     # [R, D] f32
    bias = bias_ref[...]               # [R, R] f32 — hoisted out of all loops
    keep = bias == 0.0                 # bool, computed once (post-softmax re-mask)

    for layer in range(NUM_LAYERS):
        # --- SublayerConnection: LayerNorm (biased variance, eps=1e-5, PyTorch) ---
        mu = jnp.mean(x, axis=-1, keepdims=True)
        var = jnp.mean((x - mu) ** 2, axis=-1, keepdims=True)
        xn = (x - mu) * jax.lax.rsqrt(var + LN_EPS)
        xn = xn * ln_w_ref[layer] + ln_b_ref[layer]                          # [R, D]

        # --- fused Q/K/V projection: one MXU matmul instead of three ---
        qkv = jnp.dot(xn, wqkv_ref[layer], preferred_element_type=jnp.float32)  # [R, 3D]

        # --- scaled dot-product attention per head (q already pre-scaled) ---
        head_outs = []
        for h in range(HEADS):
            lo = h * D_K
            qh = qkv[:, lo:lo + D_K]                           # [R, D_K]
            kh = qkv[:, D + lo:D + lo + D_K]
            vh = qkv[:, 2 * D + lo:2 * D + lo + D_K]
            s = jnp.dot(qh, kh.T, preferred_element_type=jnp.float32) + bias  # [R, R]
            s = s - jnp.max(s, axis=-1, keepdims=True)
            e = jnp.exp(s)
            p = e * pl.reciprocal(jnp.sum(e, axis=-1, keepdims=True), approx=True)
            p = jnp.where(keep, p, 0.0)                        # masked_fill after softmax
            head_outs.append(jnp.dot(p, vh, preferred_element_type=jnp.float32))
        attn = jnp.concatenate(head_outs, axis=-1)             # [R, D]

        # --- output projection + residual (dropout = identity in eval) ---
        x = x + jnp.dot(attn, wo_ref[layer], preferred_element_type=jnp.float32)

    out_ref[...] = x.astype(out_ref.dtype)


def _num_batch_blocks(b):
    """v7x has 2 TensorCores -> keep a parallel batch grid; single-TC v5e/v6e
    collapse to one grid step (per-step pipeline overhead dominates here)."""
    try:
        kind = jax.devices()[0].device_kind.lower()
    except Exception:
        kind = ""
    if ("v7" in kind or "7x" in kind) and b > 1:
        return b
    return 1


def transformer_layer(x, mask, params):
    """Forward of the transformer block stack. Returns (emb, cls_emb)."""
    ln_w, ln_b, wq, wk, wv, wo = params
    b, s, d = x.shape
    assert (b, s, d) == (B, S, D)

    # --- host-side weight re-layout (folded by XLA; nothing transposed in-kernel) ---
    scale = 1.0 / math.sqrt(D_K)
    wq_io = jnp.swapaxes(wq, 1, 2) * scale            # [L, D, D] in->out, scale folded
    wk_io = jnp.swapaxes(wk, 1, 2)
    wv_io = jnp.swapaxes(wv, 1, 2)
    wqkv = jnp.concatenate([wq_io, wk_io, wv_io], axis=-1)   # [L, D, 3D]
    wo_io = jnp.swapaxes(wo, 1, 2)                            # [L, D, D]

    # --- additive attention bias precomputed once (replaces in-kernel compares) ---
    if mask is None:
        pair = jnp.ones((b, s, s), dtype=jnp.float32)
    else:
        pair = jnp.einsum('ab,ac->abc', mask, mask)           # torch.einsum('ab,ac->abc')
    bias_b = jnp.where(pair == 0, NEG_INF, 0.0).astype(jnp.float32)   # [B, S, S]

    blocks = _num_batch_blocks(b)
    bb = b // blocks                    # batch elements per grid step
    rows = bb * s                       # rows per block (batch folded onto sublanes)

    x2 = x.reshape(b * s, d)
    if blocks == 1:
        # whole batch as one attention problem with a block-diagonal bias:
        # cross-batch scores get -1e9 -> exp underflows to exactly 0.
        same = jnp.arange(b)[:, None] == jnp.arange(b)[None, :]          # [B, B]
        bias4 = jnp.where(same[:, None, :, None], bias_b[:, :, None, :], NEG_INF)
        bias_arr = bias4.reshape(b * s, b * s)                           # [BS, BS]
    else:
        bias_arr = bias_b.reshape(b * s, s)                              # [BS, S]

    out2 = pl.pallas_call(
        _transformer_kernel,
        out_shape=jax.ShapeDtypeStruct((b * s, d), x.dtype),
        grid=(blocks,),
        in_specs=[
            pl.BlockSpec((rows, d), lambda i: (i, 0)),                   # x rows
            pl.BlockSpec((rows, rows), lambda i: (i, 0)),                # additive bias
            pl.BlockSpec((NUM_LAYERS, 1, d), lambda i: (0, 0, 0)),       # ln_w
            pl.BlockSpec((NUM_LAYERS, 1, d), lambda i: (0, 0, 0)),       # ln_b
            pl.BlockSpec((NUM_LAYERS, d, 3 * d), lambda i: (0, 0, 0)),   # wqkv (fused)
            pl.BlockSpec((NUM_LAYERS, d, d), lambda i: (0, 0, 0)),       # wo
        ],
        out_specs=pl.BlockSpec((rows, d), lambda i: (i, 0)),
        compiler_params=pltpu.CompilerParams(
            dimension_semantics=("parallel",)),
    )(x2, bias_arr, ln_w, ln_b, wqkv, wo_io)

    emb = out2.reshape(b, s, d)
    cls_emb = emb[:, 0, :]
    return emb, cls_emb


def init_params(key):
    ks = jax.random.split(key, 4)
    lim = 1.0 / math.sqrt(D)
    # LayerNorm init: weight=1, bias=0 (PyTorch default)
    ln_w = jnp.ones((NUM_LAYERS, 1, D), jnp.float32)
    ln_b = jnp.zeros((NUM_LAYERS, 1, D), jnp.float32)
    # Linear(bias=False) weights, uniform(-1/sqrt(D), 1/sqrt(D)), PyTorch [out, in] layout
    wq = jax.random.uniform(ks[0], (NUM_LAYERS, D, D), jnp.float32, -lim, lim)
    wk = jax.random.uniform(ks[1], (NUM_LAYERS, D, D), jnp.float32, -lim, lim)
    wv = jax.random.uniform(ks[2], (NUM_LAYERS, D, D), jnp.float32, -lim, lim)
    wo = jax.random.uniform(ks[3], (NUM_LAYERS, D, D), jnp.float32, -lim, lim)
    return ln_w, ln_b, wq, wk, wv, wo


if __name__ == "__main__":
    key = jax.random.PRNGKey(0)
    k_x, k_p = jax.random.split(key)

    x = jax.random.normal(k_x, (B, S, D), jnp.float32)
    # 1-D visit mask [B, S]: first row fully valid, second row has padding
    lengths = jnp.array([S, 5])
    mask = (jnp.arange(S)[None, :] < lengths[:, None]).astype(jnp.float32)

    params = init_params(k_p)

    emb, cls_emb = transformer_layer(x, mask, params)
    jax.block_until_ready((emb, cls_emb))

    assert emb.shape == (B, S, D)
    assert cls_emb.shape == (B, D)
    assert jnp.all(jnp.isfinite(emb))
    print("KERNEL_OK")
</pallas_src>

<mosaic_0001>
module attributes {stable_mosaic.version = 11 : i64} {
  func.func @_transformer_kernel(%arg0: i32, %arg1: memref<16x32xf32, #tpu.memory_space<vmem>>, %arg2: memref<16x16xf32, #tpu.memory_space<vmem>>, %arg3: memref<2x1x32xf32, #tpu.memory_space<vmem>>, %arg4: memref<2x1x32xf32, #tpu.memory_space<vmem>>, %arg5: memref<2x32x96xf32, #tpu.memory_space<vmem>>, %arg6: memref<2x32x32xf32, #tpu.memory_space<vmem>>, %arg7: memref<16x32xf32, #tpu.memory_space<vmem>>) attributes {dimension_semantics = [#tpu.dimension_semantics<parallel>], iteration_bounds = array<i64: 1>, scalar_prefetch = 0 : i64, scratch_operands = 0 : i64, tpu.core_type = #tpu.core_type<tc>, window_params = [{transform_indices = @transform_0, window_bounds = array<i64: 16, 32>}, {transform_indices = @transform_1, window_bounds = array<i64: 16, 16>}, {pipeline_mode = #tpu.pipeline_mode<synchronous>, transform_indices = @transform_2, window_bounds = array<i64: 2, 1, 32>}, {pipeline_mode = #tpu.pipeline_mode<synchronous>, transform_indices = @transform_3, window_bounds = array<i64: 2, 1, 32>}, {pipeline_mode = #tpu.pipeline_mode<synchronous>, transform_indices = @transform_4, window_bounds = array<i64: 2, 32, 96>}, {pipeline_mode = #tpu.pipeline_mode<synchronous>, transform_indices = @transform_5, window_bounds = array<i64: 2, 32, 32>}, {transform_indices = @transform_6, window_bounds = array<i64: 16, 32>}]} {
    %c0 = arith.constant 0 : index
    %c0_0 = arith.constant 0 : index
    %0 = vector.load %arg1[%c0, %c0_0] : memref<16x32xf32, #tpu.memory_space<vmem>>, vector<16x32xf32>
    %c0_1 = arith.constant 0 : index
    %c0_2 = arith.constant 0 : index
    %1 = vector.load %arg2[%c0_1, %c0_2] : memref<16x16xf32, #tpu.memory_space<vmem>>, vector<16x16xf32>
    %cst = arith.constant 0.000000e+00 : f32
    %2 = vector.broadcast %cst : f32 to vector<16x16xf32>
    %3 = arith.cmpf oeq, %1, %2 : vector<16x16xf32>
    %cst_3 = arith.constant dense<0.000000e+00> : vector<16xf32>
    %4 = vector.multi_reduction <add>, %0, %cst_3 [1] : vector<16x32xf32> to vector<16xf32>
    %5 = vector.shape_cast %4 : vector<16xf32> to vector<16x1xf32>
    %cst_4 = arith.constant 3.200000e+01 : f32
    %6 = vector.broadcast %cst_4 : f32 to vector<16x1xf32>
    %7 = arith.divf %5, %6 : vector<16x1xf32>
    %8 = vector.broadcast %7 : vector<16x1xf32> to vector<16x32xf32>
    %9 = arith.subf %0, %8 : vector<16x32xf32>
    %10 = arith.mulf %9, %9 : vector<16x32xf32>
    %cst_5 = arith.constant dense<0.000000e+00> : vector<16xf32>
    %11 = vector.multi_reduction <add>, %10, %cst_5 [1] : vector<16x32xf32> to vector<16xf32>
    %12 = vector.shape_cast %11 : vector<16xf32> to vector<16x1xf32>
    %cst_6 = arith.constant 3.200000e+01 : f32
    %13 = vector.broadcast %cst_6 : f32 to vector<16x1xf32>
    %14 = arith.divf %12, %13 : vector<16x1xf32>
    %15 = vector.broadcast %7 : vector<16x1xf32> to vector<16x32xf32>
    %16 = arith.subf %0, %15 : vector<16x32xf32>
    %cst_7 = arith.constant 9.99999974E-6 : f32
    %17 = vector.broadcast %cst_7 : f32 to vector<16x1xf32>
    %18 = arith.addf %14, %17 : vector<16x1xf32>
    %19 = math.rsqrt %18 : vector<16x1xf32>
    %20 = vector.broadcast %19 : vector<16x1xf32> to vector<16x32xf32>
    %21 = arith.mulf %16, %20 : vector<16x32xf32>
    %c0_8 = arith.constant 0 : index
    %c0_9 = arith.constant 0 : index
    %c0_10 = arith.constant 0 : index
    %22 = vector.load %arg3[%c0_8, %c0_9, %c0_10] : memref<2x1x32xf32, #tpu.memory_space<vmem>>, vector<1x1x32xf32>
    %23 = vector.shape_cast %22 : vector<1x1x32xf32> to vector<1x32xf32>
    %24 = vector.broadcast %23 : vector<1x32xf32> to vector<16x32xf32>
    %25 = arith.mulf %21, %24 : vector<16x32xf32>
    %c0_11 = arith.constant 0 : index
    %c0_12 = arith.constant 0 : index
    %c0_13 = arith.constant 0 : index
    %26 = vector.load %arg4[%c0_11, %c0_12, %c0_13] : memref<2x1x32xf32, #tpu.memory_space<vmem>>, vector<1x1x32xf32>
    %27 = vector.shape_cast %26 : vector<1x1x32xf32> to vector<1x32xf32>
    %28 = vector.broadcast %27 : vector<1x32xf32> to vector<16x32xf32>
    %29 = arith.addf %25, %28 : vector<16x32xf32>
    %c0_14 = arith.constant 0 : index
    %c0_15 = arith.constant 0 : index
    %c0_16 = arith.constant 0 : index
    %30 = vector.load %arg5[%c0_14, %c0_15, %c0_16] : memref<2x32x96xf32, #tpu.memory_space<vmem>>, vector<1x32x96xf32>
    %31 = vector.shape_cast %30 : vector<1x32x96xf32> to vector<32x96xf32>
    %cst_17 = arith.constant dense<0.000000e+00> : vector<16x96xf32>
    %32 = tpu.matmul %29, %31, %cst_17 {dimension_numbers = #tpu.dot_dimension_numbers<[1], [0], [0], [1], [0, 0, 1, 1], [], []>} : vector<16x32xf32>, vector<32x96xf32>, vector<16x96xf32> -> vector<16x96xf32>
    %33 = vector.extract_strided_slice %32 {offsets = [0, 0], sizes = [16, 4], strides = [1, 1]} : vector<16x96xf32> to vector<16x4xf32>
    %34 = vector.extract_strided_slice %32 {offsets = [0, 32], sizes = [16, 4], strides = [1, 1]} : vector<16x96xf32> to vector<16x4xf32>
    %35 = vector.extract_strided_slice %32 {offsets = [0, 64], sizes = [16, 4], strides = [1, 1]} : vector<16x96xf32> to vector<16x4xf32>
    %36 = tpu.transpose %34, [1, 0] : vector<16x4xf32> -> vector<4x16xf32>
    %cst_18 = arith.constant dense<0.000000e+00> : vector<16x16xf32>
    %37 = tpu.matmul %33, %36, %cst_18 {dimension_numbers = #tpu.dot_dimension_numbers<[1], [0], [0], [1], [0, 0, 1, 1], [], []>} : vector<16x4xf32>, vector<4x16xf32>, vector<16x16xf32> -> vector<16x16xf32>
    %38 = arith.addf %37, %1 : vector<16x16xf32>
    %cst_19 = arith.constant dense<0xFF800000> : vector<16xf32>
    %39 = vector.multi_reduction <maximumf>, %38, %cst_19 [1] : vector<16x16xf32> to vector<16xf32>
    %40 = vector.shape_cast %39 : vector<16xf32> to vector<16x1xf32>
    %41 = vector.broadcast %40 : vector<16x1xf32> to vector<16x16xf32>
    %42 = arith.subf %38, %41 : vector<16x16xf32>
    %43 = math.exp %42 : vector<16x16xf32>
    %cst_20 = arith.constant dense<0.000000e+00> : vector<16xf32>
    %44 = vector.multi_reduction <add>, %43, %cst_20 [1] : vector<16x16xf32> to vector<16xf32>
    %45 = vector.shape_cast %44 : vector<16xf32> to vector<16x1xf32>
    %46 = tpu.reciprocal %45 {approx = true} : vector<16x1xf32> -> vector<16x1xf32>
    %47 = vector.broadcast %46 : vector<16x1xf32> to vector<16x16xf32>
    %48 = arith.mulf %43, %47 : vector<16x16xf32>
    %cst_21 = arith.constant 0.000000e+00 : f32
    %49 = vector.broadcast %cst_21 : f32 to vector<16x16xf32>
    %50 = arith.select %3, %48, %49 : vector<16x16xi1>, vector<16x16xf32>
    %cst_22 = arith.constant dense<0.000000e+00> : vector<16x4xf32>
    %51 = tpu.matmul %50, %35, %cst_22 {dimension_numbers = #tpu.dot_dimension_numbers<[1], [0], [0], [1], [0, 0, 1, 1], [], []>} : vector<16x16xf32>, vector<16x4xf32>, vector<16x4xf32> -> vector<16x4xf32>
    %52 = vector.extract_strided_slice %32 {offsets = [0, 4], sizes = [16, 4], strides = [1, 1]} : vector<16x96xf32> to vector<16x4xf32>
    %53 = vector.extract_strided_slice %32 {offsets = [0, 36], sizes = [16, 4], strides = [1, 1]} : vector<16x96xf32> to vector<16x4xf32>
    %54 = vector.extract_strided_slice %32 {offsets = [0, 68], sizes = [16, 4], strides = [1, 1]} : vector<16x96xf32> to vector<16x4xf32>
    %55 = tpu.transpose %53, [1, 0] : vector<16x4xf32> -> vector<4x16xf32>
    %cst_23 = arith.constant dense<0.000000e+00> : vector<16x16xf32>
    %56 = tpu.matmul %52, %55, %cst_23 {dimension_numbers = #tpu.dot_dimension_numbers<[1], [0], [0], [1], [0, 0, 1, 1], [], []>} : vector<16x4xf32>, vector<4x16xf32>, vector<16x16xf32> -> vector<16x16xf32>
    %57 = arith.addf %56, %1 : vector<16x16xf32>
    %cst_24 = arith.constant dense<0xFF800000> : vector<16xf32>
    %58 = vector.multi_reduction <maximumf>, %57, %cst_24 [1] : vector<16x16xf32> to vector<16xf32>
    %59 = vector.shape_cast %58 : vector<16xf32> to vector<16x1xf32>
    %60 = vector.broadcast %59 : vector<16x1xf32> to vector<16x16xf32>
    %61 = arith.subf %57, %60 : vector<16x16xf32>
    %62 = math.exp %61 : vector<16x16xf32>
    %cst_25 = arith.constant dense<0.000000e+00> : vector<16xf32>
    %63 = vector.multi_reduction <add>, %62, %cst_25 [1] : vector<16x16xf32> to vector<16xf32>
    %64 = vector.shape_cast %63 : vector<16xf32> to vector<16x1xf32>
    %65 = tpu.reciprocal %64 {approx = true} : vector<16x1xf32> -> vector<16x1xf32>
    %66 = vector.broadcast %65 : vector<16x1xf32> to vector<16x16xf32>
    %67 = arith.mulf %62, %66 : vector<16x16xf32>
    %cst_26 = arith.constant 0.000000e+00 : f32
    %68 = vector.broadcast %cst_26 : f32 to vector<16x16xf32>
    %69 = arith.select %3, %67, %68 : vector<16x16xi1>, vector<16x16xf32>
    %cst_27 = arith.constant dense<0.000000e+00> : vector<16x4xf32>
    %70 = tpu.matmul %69, %54, %cst_27 {dimension_numbers = #tpu.dot_dimension_numbers<[1], [0], [0], [1], [0, 0, 1, 1], [], []>} : vector<16x16xf32>, vector<16x4xf32>, vector<16x4xf32> -> vector<16x4xf32>
    %71 = vector.extract_strided_slice %32 {offsets = [0, 8], sizes = [16, 4], strides = [1, 1]} : vector<16x96xf32> to vector<16x4xf32>
    %72 = vector.extract_strided_slice %32 {offsets = [0, 40], sizes = [16, 4], strides = [1, 1]} : vector<16x96xf32> to vector<16x4xf32>
    %73 = vector.extract_strided_slice %32 {offsets = [0, 72], sizes = [16, 4], strides = [1, 1]} : vector<16x96xf32> to vector<16x4xf32>
    %74 = tpu.transpose %72, [1, 0] : vector<16x4xf32> -> vector<4x16xf32>
    %cst_28 = arith.constant dense<0.000000e+00> : vector<16x16xf32>
    %75 = tpu.matmul %71, %74, %cst_28 {dimension_numbers = #tpu.dot_dimension_numbers<[1], [0], [0], [1], [0, 0, 1, 1], [], []>} : vector<16x4xf32>, vector<4x16xf32>, vector<16x16xf32> -> vector<16x16xf32>
    %76 = arith.addf %75, %1 : vector<16x16xf32>
    %cst_29 = arith.constant dense<0xFF800000> : vector<16xf32>
    %77 = vector.multi_reduction <maximumf>, %76, %cst_29 [1] : vector<16x16xf32> to vector<16xf32>
    %78 = vector.shape_cast %77 : vector<16xf32> to vector<16x1xf32>
    %79 = vector.broadcast %78 : vector<16x1xf32> to vector<16x16xf32>
    %80 = arith.subf %76, %79 : vector<16x16xf32>
    %81 = math.exp %80 : vector<16x16xf32>
    %cst_30 = arith.constant dense<0.000000e+00> : vector<16xf32>
    %82 = vector.multi_reduction <add>, %81, %cst_30 [1] : vector<16x16xf32> to vector<16xf32>
    %83 = vector.shape_cast %82 : vector<16xf32> to vector<16x1xf32>
    %84 = tpu.reciprocal %83 {approx = true} : vector<16x1xf32> -> vector<16x1xf32>
    %85 = vector.broadcast %84 : vector<16x1xf32> to vector<16x16xf32>
    %86 = arith.mulf %81, %85 : vector<16x16xf32>
    %cst_31 = arith.constant 0.000000e+00 : f32
    %87 = vector.broadcast %cst_31 : f32 to vector<16x16xf32>
    %88 = arith.select %3, %86, %87 : vector<16x16xi1>, vector<16x16xf32>
    %cst_32 = arith.constant dense<0.000000e+00> : vector<16x4xf32>
    %89 = tpu.matmul %88, %73, %cst_32 {dimension_numbers = #tpu.dot_dimension_numbers<[1], [0], [0], [1], [0, 0, 1, 1], [], []>} : vector<16x16xf32>, vector<16x4xf32>, vector<16x4xf32> -> vector<16x4xf32>
    %90 = vector.extract_strided_slice %32 {offsets = [0, 12], sizes = [16, 4], strides = [1, 1]} : vector<16x96xf32> to vector<16x4xf32>
    %91 = vector.extract_strided_slice %32 {offsets = [0, 44], sizes = [16, 4], strides = [1, 1]} : vector<16x96xf32> to vector<16x4xf32>
    %92 = vector.extract_strided_slice %32 {offsets = [0, 76], sizes = [16, 4], strides = [1, 1]} : vector<16x96xf32> to vector<16x4xf32>
    %93 = tpu.transpose %91, [1, 0] : vector<16x4xf32> -> vector<4x16xf32>
    %cst_33 = arith.constant dense<0.000000e+00> : vector<16x16xf32>
    %94 = tpu.matmul %90, %93, %cst_33 {dimension_numbers = #tpu.dot_dimension_numbers<[1], [0], [0], [1], [0, 0, 1, 1], [], []>} : vector<16x4xf32>, vector<4x16xf32>, vector<16x16xf32> -> vector<16x16xf32>
    %95 = arith.addf %94, %1 : vector<16x16xf32>
    %cst_34 = arith.constant dense<0xFF800000> : vector<16xf32>
    %96 = vector.multi_reduction <maximumf>, %95, %cst_34 [1] : vector<16x16xf32> to vector<16xf32>
    %97 = vector.shape_cast %96 : vector<16xf32> to vector<16x1xf32>
    %98 = vector.broadcast %97 : vector<16x1xf32> to vector<16x16xf32>
    %99 = arith.subf %95, %98 : vector<16x16xf32>
    %100 = math.exp %99 : vector<16x16xf32>
    %cst_35 = arith.constant dense<0.000000e+00> : vector<16xf32>
    %101 = vector.multi_reduction <add>, %100, %cst_35 [1] : vector<16x16xf32> to vector<16xf32>
    %102 = vector.shape_cast %101 : vector<16xf32> to vector<16x1xf32>
    %103 = tpu.reciprocal %102 {approx = true} : vector<16x1xf32> -> vector<16x1xf32>
    %104 = vector.broadcast %103 : vector<16x1xf32> to vector<16x16xf32>
    %105 = arith.mulf %100, %104 : vector<16x16xf32>
    %cst_36 = arith.constant 0.000000e+00 : f32
    %106 = vector.broadcast %cst_36 : f32 to vector<16x16xf32>
    %107 = arith.select %3, %105, %106 : vector<16x16xi1>, vector<16x16xf32>
    %cst_37 = arith.constant dense<0.000000e+00> : vector<16x4xf32>
    %108 = tpu.matmul %107, %92, %cst_37 {dimension_numbers = #tpu.dot_dimension_numbers<[1], [0], [0], [1], [0, 0, 1, 1], [], []>} : vector<16x16xf32>, vector<16x4xf32>, vector<16x4xf32> -> vector<16x4xf32>
    %109 = vector.extract_strided_slice %32 {offsets = [0, 16], sizes = [16, 4], strides = [1, 1]} : vector<16x96xf32> to vector<16x4xf32>
    %110 = vector.extract_strided_slice %32 {offsets = [0, 48], sizes = [16, 4], strides = [1, 1]} : vector<16x96xf32> to vector<16x4xf32>
    %111 = vector.extract_strided_slice %32 {offsets = [0, 80], sizes = [16, 4], strides = [1, 1]} : vector<16x96xf32> to vector<16x4xf32>
    %112 = tpu.transpose %110, [1, 0] : vector<16x4xf32> -> vector<4x16xf32>
    %cst_38 = arith.constant dense<0.000000e+00> : vector<16x16xf32>
    %113 = tpu.matmul %109, %112, %cst_38 {dimension_numbers = #tpu.dot_dimension_numbers<[1], [0], [0], [1], [0, 0, 1, 1], [], []>} : vector<16x4xf32>, vector<4x16xf32>, vector<16x16xf32> -> vector<16x16xf32>
    %114 = arith.addf %113, %1 : vector<16x16xf32>
    %cst_39 = arith.constant dense<0xFF800000> : vector<16xf32>
    %115 = vector.multi_reduction <maximumf>, %114, %cst_39 [1] : vector<16x16xf32> to vector<16xf32>
    %116 = vector.shape_cast %115 : vector<16xf32> to vector<16x1xf32>
    %117 = vector.broadcast %116 : vector<16x1xf32> to vector<16x16xf32>
    %118 = arith.subf %114, %117 : vector<16x16xf32>
    %119 = math.exp %118 : vector<16x16xf32>
    %cst_40 = arith.constant dense<0.000000e+00> : vector<16xf32>
    %120 = vector.multi_reduction <add>, %119, %cst_40 [1] : vector<16x16xf32> to vector<16xf32>
    %121 = vector.shape_cast %120 : vector<16xf32> to vector<16x1xf32>
    %122 = tpu.reciprocal %121 {approx = true} : vector<16x1xf32> -> vector<16x1xf32>
    %123 = vector.broadcast %122 : vector<16x1xf32> to vector<16x16xf32>
    %124 = arith.mulf %119, %123 : vector<16x16xf32>
    %cst_41 = arith.constant 0.000000e+00 : f32
    %125 = vector.broadcast %cst_41 : f32 to vector<16x16xf32>
    %126 = arith.select %3, %124, %125 : vector<16x16xi1>, vector<16x16xf32>
    %cst_42 = arith.constant dense<0.000000e+00> : vector<16x4xf32>
    %127 = tpu.matmul %126, %111, %cst_42 {dimension_numbers = #tpu.dot_dimension_numbers<[1], [0], [0], [1], [0, 0, 1, 1], [], []>} : vector<16x16xf32>, vector<16x4xf32>, vector<16x4xf32> -> vector<16x4xf32>
    %128 = vector.extract_strided_slice %32 {offsets = [0, 20], sizes = [16, 4], strides = [1, 1]} : vector<16x96xf32> to vector<16x4xf32>
    %129 = vector.extract_strided_slice %32 {offsets = [0, 52], sizes = [16, 4], strides = [1, 1]} : vector<16x96xf32> to vector<16x4xf32>
    %130 = vector.extract_strided_slice %32 {offsets = [0, 84], sizes = [16, 4], strides = [1, 1]} : vector<16x96xf32> to vector<16x4xf32>
    %131 = tpu.transpose %129, [1, 0] : vector<16x4xf32> -> vector<4x16xf32>
    %cst_43 = arith.constant dense<0.000000e+00> : vector<16x16xf32>
    %132 = tpu.matmul %128, %131, %cst_43 {dimension_numbers = #tpu.dot_dimension_numbers<[1], [0], [0], [1], [0, 0, 1, 1], [], []>} : vector<16x4xf32>, vector<4x16xf32>, vector<16x16xf32> -> vector<16x16xf32>
    %133 = arith.addf %132, %1 : vector<16x16xf32>
    %cst_44 = arith.constant dense<0xFF800000> : vector<16xf32>
    %134 = vector.multi_reduction <maximumf>, %133, %cst_44 [1] : vector<16x16xf32> to vector<16xf32>
    %135 = vector.shape_cast %134 : vector<16xf32> to vector<16x1xf32>
    %136 = vector.broadcast %135 : vector<16x1xf32> to vector<16x16xf32>
    %137 = arith.subf %133, %136 : vector<16x16xf32>
    %138 = math.exp %137 : vector<16x16xf32>
    %cst_45 = arith.constant dense<0.000000e+00> : vector<16xf32>
    %139 = vector.multi_reduction <add>, %138, %cst_45 [1] : vector<16x16xf32> to vector<16xf32>
    %140 = vector.shape_cast %139 : vector<16xf32> to vector<16x1xf32>
    %141 = tpu.reciprocal %140 {approx = true} : vector<16x1xf32> -> vector<16x1xf32>
    %142 = vector.broadcast %141 : vector<16x1xf32> to vector<16x16xf32>
    %143 = arith.mulf %138, %142 : vector<16x16xf32>
    %cst_46 = arith.constant 0.000000e+00 : f32
    %144 = vector.broadcast %cst_46 : f32 to vector<16x16xf32>
    %145 = arith.select %3, %143, %144 : vector<16x16xi1>, vector<16x16xf32>
    %cst_47 = arith.constant dense<0.000000e+00> : vector<16x4xf32>
    %146 = tpu.matmul %145, %130, %cst_47 {dimension_numbers = #tpu.dot_dimension_numbers<[1], [0], [0], [1], [0, 0, 1, 1], [], []>} : vector<16x16xf32>, vector<16x4xf32>, vector<16x4xf32> -> vector<16x4xf32>
    %147 = vector.extract_strided_slice %32 {offsets = [0, 24], sizes = [16, 4], strides = [1, 1]} : vector<16x96xf32> to vector<16x4xf32>
    %148 = vector.extract_strided_slice %32 {offsets = [0, 56], sizes = [16, 4], strides = [1, 1]} : vector<16x96xf32> to vector<16x4xf32>
    %149 = vector.extract_strided_slice %32 {offsets = [0, 88], sizes = [16, 4], strides = [1, 1]} : vector<16x96xf32> to vector<16x4xf32>
    %150 = tpu.transpose %148, [1, 0] : vector<16x4xf32> -> vector<4x16xf32>
    %cst_48 = arith.constant dense<0.000000e+00> : vector<16x16xf32>
    %151 = tpu.matmul %147, %150, %cst_48 {dimension_numbers = #tpu.dot_dimension_numbers<[1], [0], [0], [1], [0, 0, 1, 1], [], []>} : vector<16x4xf32>, vector<4x16xf32>, vector<16x16xf32> -> vector<16x16xf32>
    %152 = arith.addf %151, %1 : vector<16x16xf32>
    %cst_49 = arith.constant dense<0xFF800000> : vector<16xf32>
    %153 = vector.multi_reduction <maximumf>, %152, %cst_49 [1] : vector<16x16xf32> to vector<16xf32>
    %154 = vector.shape_cast %153 : vector<16xf32> to vector<16x1xf32>
    %155 = vector.broadcast %154 : vector<16x1xf32> to vector<16x16xf32>
    %156 = arith.subf %152, %155 : vector<16x16xf32>
    %157 = math.exp %156 : vector<16x16xf32>
    %cst_50 = arith.constant dense<0.000000e+00> : vector<16xf32>
    %158 = vector.multi_reduction <add>, %157, %cst_50 [1] : vector<16x16xf32> to vector<16xf32>
    %159 = vector.shape_cast %158 : vector<16xf32> to vector<16x1xf32>
    %160 = tpu.reciprocal %159 {approx = true} : vector<16x1xf32> -> vector<16x1xf32>
    %161 = vector.broadcast %160 : vector<16x1xf32> to vector<16x16xf32>
    %162 = arith.mulf %157, %161 : vector<16x16xf32>
    %cst_51 = arith.constant 0.000000e+00 : f32
    %163 = vector.broadcast %cst_51 : f32 to vector<16x16xf32>
    %164 = arith.select %3, %162, %163 : vector<16x16xi1>, vector<16x16xf32>
    %cst_52 = arith.constant dense<0.000000e+00> : vector<16x4xf32>
    %165 = tpu.matmul %164, %149, %cst_52 {dimension_numbers = #tpu.dot_dimension_numbers<[1], [0], [0], [1], [0, 0, 1, 1], [], []>} : vector<16x16xf32>, vector<16x4xf32>, vector<16x4xf32> -> vector<16x4xf32>
    %166 = vector.extract_strided_slice %32 {offsets = [0, 28], sizes = [16, 4], strides = [1, 1]} : vector<16x96xf32> to vector<16x4xf32>
    %167 = vector.extract_strided_slice %32 {offsets = [0, 60], sizes = [16, 4], strides = [1, 1]} : vector<16x96xf32> to vector<16x4xf32>
    %168 = vector.extract_strided_slice %32 {offsets = [0, 92], sizes = [16, 4], strides = [1, 1]} : vector<16x96xf32> to vector<16x4xf32>
    %169 = tpu.transpose %167, [1, 0] : vector<16x4xf32> -> vector<4x16xf32>
    %cst_53 = arith.constant dense<0.000000e+00> : vector<16x16xf32>
    %170 = tpu.matmul %166, %169, %cst_53 {dimension_numbers = #tpu.dot_dimension_numbers<[1], [0], [0], [1], [0, 0, 1, 1], [], []>} : vector<16x4xf32>, vector<4x16xf32>, vector<16x16xf32> -> vector<16x16xf32>
    %171 = arith.addf %170, %1 : vector<16x16xf32>
    %cst_54 = arith.constant dense<0xFF800000> : vector<16xf32>
    %172 = vector.multi_reduction <maximumf>, %171, %cst_54 [1] : vector<16x16xf32> to vector<16xf32>
    %173 = vector.shape_cast %172 : vector<16xf32> to vector<16x1xf32>
    %174 = vector.broadcast %173 : vector<16x1xf32> to vector<16x16xf32>
    %175 = arith.subf %171, %174 : vector<16x16xf32>
    %176 = math.exp %175 : vector<16x16xf32>
    %cst_55 = arith.constant dense<0.000000e+00> : vector<16xf32>
    %177 = vector.multi_reduction <add>, %176, %cst_55 [1] : vector<16x16xf32> to vector<16xf32>
    %178 = vector.shape_cast %177 : vector<16xf32> to vector<16x1xf32>
    %179 = tpu.reciprocal %178 {approx = true} : vector<16x1xf32> -> vector<16x1xf32>
    %180 = vector.broadcast %179 : vector<16x1xf32> to vector<16x16xf32>
    %181 = arith.mulf %176, %180 : vector<16x16xf32>
    %cst_56 = arith.constant 0.000000e+00 : f32
    %182 = vector.broadcast %cst_56 : f32 to vector<16x16xf32>
    %183 = arith.select %3, %181, %182 : vector<16x16xi1>, vector<16x16xf32>
    %cst_57 = arith.constant dense<0.000000e+00> : vector<16x4xf32>
    %184 = tpu.matmul %183, %168, %cst_57 {dimension_numbers = #tpu.dot_dimension_numbers<[1], [0], [0], [1], [0, 0, 1, 1], [], []>} : vector<16x16xf32>, vector<16x4xf32>, vector<16x4xf32> -> vector<16x4xf32>
    %185 = tpu.concatenate %51, %70, %89, %108, %127, %146, %165, %184 in 1 : vector<16x4xf32>, vector<16x4xf32>, vector<16x4xf32>, vector<16x4xf32>, vector<16x4xf32>, vector<16x4xf32>, vector<16x4xf32>, vector<16x4xf32> -> vector<16x32xf32>
    %c0_58 = arith.constant 0 : index
    %c0_59 = arith.constant 0 : index
    %c0_60 = arith.constant 0 : index
    %186 = vector.load %arg6[%c0_58, %c0_59, %c0_60] : memref<2x32x32xf32, #tpu.memory_space<vmem>>, vector<1x32x32xf32>
    %187 = vector.shape_cast %186 : vector<1x32x32xf32> to vector<32x32xf32>
    %cst_61 = arith.constant dense<0.000000e+00> : vector<16x32xf32>
    %188 = tpu.matmul %185, %187, %cst_61 {dimension_numbers = #tpu.dot_dimension_numbers<[1], [0], [0], [1], [0, 0, 1, 1], [], []>} : vector<16x32xf32>, vector<32x32xf32>, vector<16x32xf32> -> vector<16x32xf32>
    %189 = arith.addf %0, %188 : vector<16x32xf32>
    %cst_62 = arith.constant dense<0.000000e+00> : vector<16xf32>
    %190 = vector.multi_reduction <add>, %189, %cst_62 [1] : vector<16x32xf32> to vector<16xf32>
    %191 = vector.shape_cast %190 : vector<16xf32> to vector<16x1xf32>
    %cst_63 = arith.constant 3.200000e+01 : f32
    %192 = vector.broadcast %cst_63 : f32 to vector<16x1xf32>
    %193 = arith.divf %191, %192 : vector<16x1xf32>
    %194 = vector.broadcast %193 : vector<16x1xf32> to vector<16x32xf32>
    %195 = arith.subf %189, %194 : vector<16x32xf32>
    %196 = arith.mulf %195, %195 : vector<16x32xf32>
    %cst_64 = arith.constant dense<0.000000e+00> : vector<16xf32>
    %197 = vector.multi_reduction <add>, %196, %cst_64 [1] : vector<16x32xf32> to vector<16xf32>
    %198 = vector.shape_cast %197 : vector<16xf32> to vector<16x1xf32>
    %cst_65 = arith.constant 3.200000e+01 : f32
    %199 = vector.broadcast %cst_65 : f32 to vector<16x1xf32>
    %200 = arith.divf %198, %199 : vector<16x1xf32>
    %201 = vector.broadcast %193 : vector<16x1xf32> to vector<16x32xf32>
    %202 = arith.subf %189, %201 : vector<16x32xf32>
    %cst_66 = arith.constant 9.99999974E-6 : f32
    %203 = vector.broadcast %cst_66 : f32 to vector<16x1xf32>
    %204 = arith.addf %200, %203 : vector<16x1xf32>
    %205 = math.rsqrt %204 : vector<16x1xf32>
    %206 = vector.broadcast %205 : vector<16x1xf32> to vector<16x32xf32>
    %207 = arith.mulf %202, %206 : vector<16x32xf32>
    %c1 = arith.constant 1 : index
    %c0_67 = arith.constant 0 : index
    %c0_68 = arith.constant 0 : index
    %208 = vector.load %arg3[%c1, %c0_67, %c0_68] : memref<2x1x32xf32, #tpu.memory_space<vmem>>, vector<1x1x32xf32>
    %209 = vector.shape_cast %208 : vector<1x1x32xf32> to vector<1x32xf32>
    %210 = vector.broadcast %209 : vector<1x32xf32> to vector<16x32xf32>
    %211 = arith.mulf %207, %210 : vector<16x32xf32>
    %c1_69 = arith.constant 1 : index
    %c0_70 = arith.constant 0 : index
    %c0_71 = arith.constant 0 : index
    %212 = vector.load %arg4[%c1_69, %c0_70, %c0_71] : memref<2x1x32xf32, #tpu.memory_space<vmem>>, vector<1x1x32xf32>
    %213 = vector.shape_cast %212 : vector<1x1x32xf32> to vector<1x32xf32>
    %214 = vector.broadcast %213 : vector<1x32xf32> to vector<16x32xf32>
    %215 = arith.addf %211, %214 : vector<16x32xf32>
    %c1_72 = arith.constant 1 : index
    %c0_73 = arith.constant 0 : index
    %c0_74 = arith.constant 0 : index
    %216 = vector.load %arg5[%c1_72, %c0_73, %c0_74] : memref<2x32x96xf32, #tpu.memory_space<vmem>>, vector<1x32x96xf32>
    %217 = vector.shape_cast %216 : vector<1x32x96xf32> to vector<32x96xf32>
    %cst_75 = arith.constant dense<0.000000e+00> : vector<16x96xf32>
    %218 = tpu.matmul %215, %217, %cst_75 {dimension_numbers = #tpu.dot_dimension_numbers<[1], [0], [0], [1], [0, 0, 1, 1], [], []>} : vector<16x32xf32>, vector<32x96xf32>, vector<16x96xf32> -> vector<16x96xf32>
    %219 = vector.extract_strided_slice %218 {offsets = [0, 0], sizes = [16, 4], strides = [1, 1]} : vector<16x96xf32> to vector<16x4xf32>
    %220 = vector.extract_strided_slice %218 {offsets = [0, 32], sizes = [16, 4], strides = [1, 1]} : vector<16x96xf32> to vector<16x4xf32>
    %221 = vector.extract_strided_slice %218 {offsets = [0, 64], sizes = [16, 4], strides = [1, 1]} : vector<16x96xf32> to vector<16x4xf32>
    %222 = tpu.transpose %220, [1, 0] : vector<16x4xf32> -> vector<4x16xf32>
    %cst_76 = arith.constant dense<0.000000e+00> : vector<16x16xf32>
    %223 = tpu.matmul %219, %222, %cst_76 {dimension_numbers = #tpu.dot_dimension_numbers<[1], [0], [0], [1], [0, 0, 1, 1], [], []>} : vector<16x4xf32>, vector<4x16xf32>, vector<16x16xf32> -> vector<16x16xf32>
    %224 = arith.addf %223, %1 : vector<16x16xf32>
    %cst_77 = arith.constant dense<0xFF800000> : vector<16xf32>
    %225 = vector.multi_reduction <maximumf>, %224, %cst_77 [1] : vector<16x16xf32> to vector<16xf32>
    %226 = vector.shape_cast %225 : vector<16xf32> to vector<16x1xf32>
    %227 = vector.broadcast %226 : vector<16x1xf32> to vector<16x16xf32>
    %228 = arith.subf %224, %227 : vector<16x16xf32>
    %229 = math.exp %228 : vector<16x16xf32>
    %cst_78 = arith.constant dense<0.000000e+00> : vector<16xf32>
    %230 = vector.multi_reduction <add>, %229, %cst_78 [1] : vector<16x16xf32> to vector<16xf32>
    %231 = vector.shape_cast %230 : vector<16xf32> to vector<16x1xf32>
    %232 = tpu.reciprocal %231 {approx = true} : vector<16x1xf32> -> vector<16x1xf32>
    %233 = vector.broadcast %232 : vector<16x1xf32> to vector<16x16xf32>
    %234 = arith.mulf %229, %233 : vector<16x16xf32>
    %cst_79 = arith.constant 0.000000e+00 : f32
    %235 = vector.broadcast %cst_79 : f32 to vector<16x16xf32>
    %236 = arith.select %3, %234, %235 : vector<16x16xi1>, vector<16x16xf32>
    %cst_80 = arith.constant dense<0.000000e+00> : vector<16x4xf32>
    %237 = tpu.matmul %236, %221, %cst_80 {dimension_numbers = #tpu.dot_dimension_numbers<[1], [0], [0], [1], [0, 0, 1, 1], [], []>} : vector<16x16xf32>, vector<16x4xf32>, vector<16x4xf32> -> vector<16x4xf32>
    %238 = vector.extract_strided_slice %218 {offsets = [0, 4], sizes = [16, 4], strides = [1, 1]} : vector<16x96xf32> to vector<16x4xf32>
    %239 = vector.extract_strided_slice %218 {offsets = [0, 36], sizes = [16, 4], strides = [1, 1]} : vector<16x96xf32> to vector<16x4xf32>
    %240 = vector.extract_strided_slice %218 {offsets = [0, 68], sizes = [16, 4], strides = [1, 1]} : vector<16x96xf32> to vector<16x4xf32>
    %241 = tpu.transpose %239, [1, 0] : vector<16x4xf32> -> vector<4x16xf32>
    %cst_81 = arith.constant dense<0.000000e+00> : vector<16x16xf32>
    %242 = tpu.matmul %238, %241, %cst_81 {dimension_numbers = #tpu.dot_dimension_numbers<[1], [0], [0], [1], [0, 0, 1, 1], [], []>} : vector<16x4xf32>, vector<4x16xf32>, vector<16x16xf32> -> vector<16x16xf32>
    %243 = arith.addf %242, %1 : vector<16x16xf32>
    %cst_82 = arith.constant dense<0xFF800000> : vector<16xf32>
    %244 = vector.multi_reduction <maximumf>, %243, %cst_82 [1] : vector<16x16xf32> to vector<16xf32>
    %245 = vector.shape_cast %244 : vector<16xf32> to vector<16x1xf32>
    %246 = vector.broadcast %245 : vector<16x1xf32> to vector<16x16xf32>
    %247 = arith.subf %243, %246 : vector<16x16xf32>
    %248 = math.exp %247 : vector<16x16xf32>
    %cst_83 = arith.constant dense<0.000000e+00> : vector<16xf32>
    %249 = vector.multi_reduction <add>, %248, %cst_83 [1] : vector<16x16xf32> to vector<16xf32>
    %250 = vector.shape_cast %249 : vector<16xf32> to vector<16x1xf32>
    %251 = tpu.reciprocal %250 {approx = true} : vector<16x1xf32> -> vector<16x1xf32>
    %252 = vector.broadcast %251 : vector<16x1xf32> to vector<16x16xf32>
    %253 = arith.mulf %248, %252 : vector<16x16xf32>
    %cst_84 = arith.constant 0.000000e+00 : f32
    %254 = vector.broadcast %cst_84 : f32 to vector<16x16xf32>
    %255 = arith.select %3, %253, %254 : vector<16x16xi1>, vector<16x16xf32>
    %cst_85 = arith.constant dense<0.000000e+00> : vector<16x4xf32>
    %256 = tpu.matmul %255, %240, %cst_85 {dimension_numbers = #tpu.dot_dimension_numbers<[1], [0], [0], [1], [0, 0, 1, 1], [], []>} : vector<16x16xf32>, vector<16x4xf32>, vector<16x4xf32> -> vector<16x4xf32>
    %257 = vector.extract_strided_slice %218 {offsets = [0, 8], sizes = [16, 4], strides = [1, 1]} : vector<16x96xf32> to vector<16x4xf32>
    %258 = vector.extract_strided_slice %218 {offsets = [0, 40], sizes = [16, 4], strides = [1, 1]} : vector<16x96xf32> to vector<16x4xf32>
    %259 = vector.extract_strided_slice %218 {offsets = [0, 72], sizes = [16, 4], strides = [1, 1]} : vector<16x96xf32> to vector<16x4xf32>
    %260 = tpu.transpose %258, [1, 0] : vector<16x4xf32> -> vector<4x16xf32>
    %cst_86 = arith.constant dense<0.000000e+00> : vector<16x16xf32>
    %261 = tpu.matmul %257, %260, %cst_86 {dimension_numbers = #tpu.dot_dimension_numbers<[1], [0], [0], [1], [0, 0, 1, 1], [], []>} : vector<16x4xf32>, vector<4x16xf32>, vector<16x16xf32> -> vector<16x16xf32>
    %262 = arith.addf %261, %1 : vector<16x16xf32>
    %cst_87 = arith.constant dense<0xFF800000> : vector<16xf32>
    %263 = vector.multi_reduction <maximumf>, %262, %cst_87 [1] : vector<16x16xf32> to vector<16xf32>
    %264 = vector.shape_cast %263 : vector<16xf32> to vector<16x1xf32>
    %265 = vector.broadcast %264 : vector<16x1xf32> to vector<16x16xf32>
    %266 = arith.subf %262, %265 : vector<16x16xf32>
    %267 = math.exp %266 : vector<16x16xf32>
    %cst_88 = arith.constant dense<0.000000e+00> : vector<16xf32>
    %268 = vector.multi_reduction <add>, %267, %cst_88 [1] : vector<16x16xf32> to vector<16xf32>
    %269 = vector.shape_cast %268 : vector<16xf32> to vector<16x1xf32>
    %270 = tpu.reciprocal %269 {approx = true} : vector<16x1xf32> -> vector<16x1xf32>
    %271 = vector.broadcast %270 : vector<16x1xf32> to vector<16x16xf32>
    %272 = arith.mulf %267, %271 : vector<16x16xf32>
    %cst_89 = arith.constant 0.000000e+00 : f32
    %273 = vector.broadcast %cst_89 : f32 to vector<16x16xf32>
    %274 = arith.select %3, %272, %273 : vector<16x16xi1>, vector<16x16xf32>
    %cst_90 = arith.constant dense<0.000000e+00> : vector<16x4xf32>
    %275 = tpu.matmul %274, %259, %cst_90 {dimension_numbers = #tpu.dot_dimension_numbers<[1], [0], [0], [1], [0, 0, 1, 1], [], []>} : vector<16x16xf32>, vector<16x4xf32>, vector<16x4xf32> -> vector<16x4xf32>
    %276 = vector.extract_strided_slice %218 {offsets = [0, 12], sizes = [16, 4], strides = [1, 1]} : vector<16x96xf32> to vector<16x4xf32>
    %277 = vector.extract_strided_slice %218 {offsets = [0, 44], sizes = [16, 4], strides = [1, 1]} : vector<16x96xf32> to vector<16x4xf32>
    %278 = vector.extract_strided_slice %218 {offsets = [0, 76], sizes = [16, 4], strides = [1, 1]} : vector<16x96xf32> to vector<16x4xf32>
    %279 = tpu.transpose %277, [1, 0] : vector<16x4xf32> -> vector<4x16xf32>
    %cst_91 = arith.constant dense<0.000000e+00> : vector<16x16xf32>
    %280 = tpu.matmul %276, %279, %cst_91 {dimension_numbers = #tpu.dot_dimension_numbers<[1], [0], [0], [1], [0, 0, 1, 1], [], []>} : vector<16x4xf32>, vector<4x16xf32>, vector<16x16xf32> -> vector<16x16xf32>
    %281 = arith.addf %280, %1 : vector<16x16xf32>
    %cst_92 = arith.constant dense<0xFF800000> : vector<16xf32>
    %282 = vector.multi_reduction <maximumf>, %281, %cst_92 [1] : vector<16x16xf32> to vector<16xf32>
    %283 = vector.shape_cast %282 : vector<16xf32> to vector<16x1xf32>
    %284 = vector.broadcast %283 : vector<16x1xf32> to vector<16x16xf32>
    %285 = arith.subf %281, %284 : vector<16x16xf32>
    %286 = math.exp %285 : vector<16x16xf32>
    %cst_93 = arith.constant dense<0.000000e+00> : vector<16xf32>
    %287 = vector.multi_reduction <add>, %286, %cst_93 [1] : vector<16x16xf32> to vector<16xf32>
    %288 = vector.shape_cast %287 : vector<16xf32> to vector<16x1xf32>
    %289 = tpu.reciprocal %288 {approx = true} : vector<16x1xf32> -> vector<16x1xf32>
    %290 = vector.broadcast %289 : vector<16x1xf32> to vector<16x16xf32>
    %291 = arith.mulf %286, %290 : vector<16x16xf32>
    %cst_94 = arith.constant 0.000000e+00 : f32
    %292 = vector.broadcast %cst_94 : f32 to vector<16x16xf32>
    %293 = arith.select %3, %291, %292 : vector<16x16xi1>, vector<16x16xf32>
    %cst_95 = arith.constant dense<0.000000e+00> : vector<16x4xf32>
    %294 = tpu.matmul %293, %278, %cst_95 {dimension_numbers = #tpu.dot_dimension_numbers<[1], [0], [0], [1], [0, 0, 1, 1], [], []>} : vector<16x16xf32>, vector<16x4xf32>, vector<16x4xf32> -> vector<16x4xf32>
    %295 = vector.extract_strided_slice %218 {offsets = [0, 16], sizes = [16, 4], strides = [1, 1]} : vector<16x96xf32> to vector<16x4xf32>
    %296 = vector.extract_strided_slice %218 {offsets = [0, 48], sizes = [16, 4], strides = [1, 1]} : vector<16x96xf32> to vector<16x4xf32>
    %297 = vector.extract_strided_slice %218 {offsets = [0, 80], sizes = [16, 4], strides = [1, 1]} : vector<16x96xf32> to vector<16x4xf32>
    %298 = tpu.transpose %296, [1, 0] : vector<16x4xf32> -> vector<4x16xf32>
    %cst_96 = arith.constant dense<0.000000e+00> : vector<16x16xf32>
    %299 = tpu.matmul %295, %298, %cst_96 {dimension_numbers = #tpu.dot_dimension_numbers<[1], [0], [0], [1], [0, 0, 1, 1], [], []>} : vector<16x4xf32>, vector<4x16xf32>, vector<16x16xf32> -> vector<16x16xf32>
    %300 = arith.addf %299, %1 : vector<16x16xf32>
    %cst_97 = arith.constant dense<0xFF800000> : vector<16xf32>
    %301 = vector.multi_reduction <maximumf>, %300, %cst_97 [1] : vector<16x16xf32> to vector<16xf32>
    %302 = vector.shape_cast %301 : vector<16xf32> to vector<16x1xf32>
    %303 = vector.broadcast %302 : vector<16x1xf32> to vector<16x16xf32>
    %304 = arith.subf %300, %303 : vector<16x16xf32>
    %305 = math.exp %304 : vector<16x16xf32>
    %cst_98 = arith.constant dense<0.000000e+00> : vector<16xf32>
    %306 = vector.multi_reduction <add>, %305, %cst_98 [1] : vector<16x16xf32> to vector<16xf32>
    %307 = vector.shape_cast %306 : vector<16xf32> to vector<16x1xf32>
    %308 = tpu.reciprocal %307 {approx = true} : vector<16x1xf32> -> vector<16x1xf32>
    %309 = vector.broadcast %308 : vector<16x1xf32> to vector<16x16xf32>
    %310 = arith.mulf %305, %309 : vector<16x16xf32>
    %cst_99 = arith.constant 0.000000e+00 : f32
    %311 = vector.broadcast %cst_99 : f32 to vector<16x16xf32>
    %312 = arith.select %3, %310, %311 : vector<16x16xi1>, vector<16x16xf32>
    %cst_100 = arith.constant dense<0.000000e+00> : vector<16x4xf32>
    %313 = tpu.matmul %312, %297, %cst_100 {dimension_numbers = #tpu.dot_dimension_numbers<[1], [0], [0], [1], [0, 0, 1, 1], [], []>} : vector<16x16xf32>, vector<16x4xf32>, vector<16x4xf32> -> vector<16x4xf32>
    %314 = vector.extract_strided_slice %218 {offsets = [0, 20], sizes = [16, 4], strides = [1, 1]} : vector<16x96xf32> to vector<16x4xf32>
    %315 = vector.extract_strided_slice %218 {offsets = [0, 52], sizes = [16, 4], strides = [1, 1]} : vector<16x96xf32> to vector<16x4xf32>
    %316 = vector.extract_strided_slice %218 {offsets = [0, 84], sizes = [16, 4], strides = [1, 1]} : vector<16x96xf32> to vector<16x4xf32>
    %317 = tpu.transpose %315, [1, 0] : vector<16x4xf32> -> vector<4x16xf32>
    %cst_101 = arith.constant dense<0.000000e+00> : vector<16x16xf32>
    %318 = tpu.matmul %314, %317, %cst_101 {dimension_numbers = #tpu.dot_dimension_numbers<[1], [0], [0], [1], [0, 0, 1, 1], [], []>} : vector<16x4xf32>, vector<4x16xf32>, vector<16x16xf32> -> vector<16x16xf32>
    %319 = arith.addf %318, %1 : vector<16x16xf32>
    %cst_102 = arith.constant dense<0xFF800000> : vector<16xf32>
    %320 = vector.multi_reduction <maximumf>, %319, %cst_102 [1] : vector<16x16xf32> to vector<16xf32>
    %321 = vector.shape_cast %320 : vector<16xf32> to vector<16x1xf32>
    %322 = vector.broadcast %321 : vector<16x1xf32> to vector<16x16xf32>
    %323 = arith.subf %319, %322 : vector<16x16xf32>
    %324 = math.exp %323 : vector<16x16xf32>
    %cst_103 = arith.constant dense<0.000000e+00> : vector<16xf32>
    %325 = vector.multi_reduction <add>, %324, %cst_103 [1] : vector<16x16xf32> to vector<16xf32>
    %326 = vector.shape_cast %325 : vector<16xf32> to vector<16x1xf32>
    %327 = tpu.reciprocal %326 {approx = true} : vector<16x1xf32> -> vector<16x1xf32>
    %328 = vector.broadcast %327 : vector<16x1xf32> to vector<16x16xf32>
    %329 = arith.mulf %324, %328 : vector<16x16xf32>
    %cst_104 = arith.constant 0.000000e+00 : f32
    %330 = vector.broadcast %cst_104 : f32 to vector<16x16xf32>
    %331 = arith.select %3, %329, %330 : vector<16x16xi1>, vector<16x16xf32>
    %cst_105 = arith.constant dense<0.000000e+00> : vector<16x4xf32>
    %332 = tpu.matmul %331, %316, %cst_105 {dimension_numbers = #tpu.dot_dimension_numbers<[1], [0], [0], [1], [0, 0, 1, 1], [], []>} : vector<16x16xf32>, vector<16x4xf32>, vector<16x4xf32> -> vector<16x4xf32>
    %333 = vector.extract_strided_slice %218 {offsets = [0, 24], sizes = [16, 4], strides = [1, 1]} : vector<16x96xf32> to vector<16x4xf32>
    %334 = vector.extract_strided_slice %218 {offsets = [0, 56], sizes = [16, 4], strides = [1, 1]} : vector<16x96xf32> to vector<16x4xf32>
    %335 = vector.extract_strided_slice %218 {offsets = [0, 88], sizes = [16, 4], strides = [1, 1]} : vector<16x96xf32> to vector<16x4xf32>
    %336 = tpu.transpose %334, [1, 0] : vector<16x4xf32> -> vector<4x16xf32>
    %cst_106 = arith.constant dense<0.000000e+00> : vector<16x16xf32>
    %337 = tpu.matmul %333, %336, %cst_106 {dimension_numbers = #tpu.dot_dimension_numbers<[1], [0], [0], [1], [0, 0, 1, 1], [], []>} : vector<16x4xf32>, vector<4x16xf32>, vector<16x16xf32> -> vector<16x16xf32>
    %338 = arith.addf %337, %1 : vector<16x16xf32>
    %cst_107 = arith.constant dense<0xFF800000> : vector<16xf32>
    %339 = vector.multi_reduction <maximumf>, %338, %cst_107 [1] : vector<16x16xf32> to vector<16xf32>
    %340 = vector.shape_cast %339 : vector<16xf32> to vector<16x1xf32>
    %341 = vector.broadcast %340 : vector<16x1xf32> to vector<16x16xf32>
    %342 = arith.subf %338, %341 : vector<16x16xf32>
    %343 = math.exp %342 : vector<16x16xf32>
    %cst_108 = arith.constant dense<0.000000e+00> : vector<16xf32>
    %344 = vector.multi_reduction <add>, %343, %cst_108 [1] : vector<16x16xf32> to vector<16xf32>
    %345 = vector.shape_cast %344 : vector<16xf32> to vector<16x1xf32>
    %346 = tpu.reciprocal %345 {approx = true} : vector<16x1xf32> -> vector<16x1xf32>
    %347 = vector.broadcast %346 : vector<16x1xf32> to vector<16x16xf32>
    %348 = arith.mulf %343, %347 : vector<16x16xf32>
    %cst_109 = arith.constant 0.000000e+00 : f32
    %349 = vector.broadcast %cst_109 : f32 to vector<16x16xf32>
    %350 = arith.select %3, %348, %349 : vector<16x16xi1>, vector<16x16xf32>
    %cst_110 = arith.constant dense<0.000000e+00> : vector<16x4xf32>
    %351 = tpu.matmul %350, %335, %cst_110 {dimension_numbers = #tpu.dot_dimension_numbers<[1], [0], [0], [1], [0, 0, 1, 1], [], []>} : vector<16x16xf32>, vector<16x4xf32>, vector<16x4xf32> -> vector<16x4xf32>
    %352 = vector.extract_strided_slice %218 {offsets = [0, 28], sizes = [16, 4], strides = [1, 1]} : vector<16x96xf32> to vector<16x4xf32>
    %353 = vector.extract_strided_slice %218 {offsets = [0, 60], sizes = [16, 4], strides = [1, 1]} : vector<16x96xf32> to vector<16x4xf32>
    %354 = vector.extract_strided_slice %218 {offsets = [0, 92], sizes = [16, 4], strides = [1, 1]} : vector<16x96xf32> to vector<16x4xf32>
    %355 = tpu.transpose %353, [1, 0] : vector<16x4xf32> -> vector<4x16xf32>
    %cst_111 = arith.constant dense<0.000000e+00> : vector<16x16xf32>
    %356 = tpu.matmul %352, %355, %cst_111 {dimension_numbers = #tpu.dot_dimension_numbers<[1], [0], [0], [1], [0, 0, 1, 1], [], []>} : vector<16x4xf32>, vector<4x16xf32>, vector<16x16xf32> -> vector<16x16xf32>
    %357 = arith.addf %356, %1 : vector<16x16xf32>
    %cst_112 = arith.constant dense<0xFF800000> : vector<16xf32>
    %358 = vector.multi_reduction <maximumf>, %357, %cst_112 [1] : vector<16x16xf32> to vector<16xf32>
    %359 = vector.shape_cast %358 : vector<16xf32> to vector<16x1xf32>
    %360 = vector.broadcast %359 : vector<16x1xf32> to vector<16x16xf32>
    %361 = arith.subf %357, %360 : vector<16x16xf32>
    %362 = math.exp %361 : vector<16x16xf32>
    %cst_113 = arith.constant dense<0.000000e+00> : vector<16xf32>
    %363 = vector.multi_reduction <add>, %362, %cst_113 [1] : vector<16x16xf32> to vector<16xf32>
    %364 = vector.shape_cast %363 : vector<16xf32> to vector<16x1xf32>
    %365 = tpu.reciprocal %364 {approx = true} : vector<16x1xf32> -> vector<16x1xf32>
    %366 = vector.broadcast %365 : vector<16x1xf32> to vector<16x16xf32>
    %367 = arith.mulf %362, %366 : vector<16x16xf32>
    %cst_114 = arith.constant 0.000000e+00 : f32
    %368 = vector.broadcast %cst_114 : f32 to vector<16x16xf32>
    %369 = arith.select %3, %367, %368 : vector<16x16xi1>, vector<16x16xf32>
    %cst_115 = arith.constant dense<0.000000e+00> : vector<16x4xf32>
    %370 = tpu.matmul %369, %354, %cst_115 {dimension_numbers = #tpu.dot_dimension_numbers<[1], [0], [0], [1], [0, 0, 1, 1], [], []>} : vector<16x16xf32>, vector<16x4xf32>, vector<16x4xf32> -> vector<16x4xf32>
    %371 = tpu.concatenate %237, %256, %275, %294, %313, %332, %351, %370 in 1 : vector<16x4xf32>, vector<16x4xf32>, vector<16x4xf32>, vector<16x4xf32>, vector<16x4xf32>, vector<16x4xf32>, vector<16x4xf32>, vector<16x4xf32> -> vector<16x32xf32>
    %c1_116 = arith.constant 1 : index
    %c0_117 = arith.constant 0 : index
    %c0_118 = arith.constant 0 : index
    %372 = vector.load %arg6[%c1_116, %c0_117, %c0_118] : memref<2x32x32xf32, #tpu.memory_space<vmem>>, vector<1x32x32xf32>
    %373 = vector.shape_cast %372 : vector<1x32x32xf32> to vector<32x32xf32>
    %cst_119 = arith.constant dense<0.000000e+00> : vector<16x32xf32>
    %374 = tpu.matmul %371, %373, %cst_119 {dimension_numbers = #tpu.dot_dimension_numbers<[1], [0], [0], [1], [0, 0, 1, 1], [], []>} : vector<16x32xf32>, vector<32x32xf32>, vector<16x32xf32> -> vector<16x32xf32>
    %375 = arith.addf %189, %374 : vector<16x32xf32>
    %c0_120 = arith.constant 0 : index
    %c0_121 = arith.constant 0 : index
    %376 = vector.load %arg7[%c0_120, %c0_121] : memref<16x32xf32, #tpu.memory_space<vmem>>, vector<16x32xf32>
    tpu.vector_store %arg7[%c0_120, %c0_121], %375 {strides = array<i32>} : memref<16x32xf32, #tpu.memory_space<vmem>>, vector<16x32xf32>,
    return
  }
  func.func @transform_0(%arg0: i32) -> (i32, i32) {
    %c0_i32 = arith.constant 0 : i32
    %c0_i32_0 = arith.constant 0 : i32
    return %arg0, %c0_i32 : i32, i32
  }
  func.func @transform_1(%arg0: i32) -> (i32, i32) {
    %c0_i32 = arith.constant 0 : i32
    %c0_i32_0 = arith.constant 0 : i32
    return %arg0, %c0_i32 : i32, i32
  }
  func.func @transform_2(%arg0: i32) -> (i32, i32, i32) {
    %c0_i32 = arith.constant 0 : i32
    %c0_i32_0 = arith.constant 0 : i32
    %c0_i32_1 = arith.constant 0 : i32
    %c0_i32_2 = arith.constant 0 : i32
    return %c0_i32, %c0_i32_0, %c0_i32_1 : i32, i32, i32
  }
  func.func @transform_3(%arg0: i32) -> (i32, i32, i32) {
    %c0_i32 = arith.constant 0 : i32
    %c0_i32_0 = arith.constant 0 : i32
    %c0_i32_1 = arith.constant 0 : i32
    %c0_i32_2 = arith.constant 0 : i32
    return %c0_i32, %c0_i32_0, %c0_i32_1 : i32, i32, i32
  }
  func.func @transform_4(%arg0: i32) -> (i32, i32, i32) {
    %c0_i32 = arith.constant 0 : i32
    %c0_i32_0 = arith.constant 0 : i32
    %c0_i32_1 = arith.constant 0 : i32
    %c0_i32_2 = arith.constant 0 : i32
    return %c0_i32, %c0_i32_0, %c0_i32_1 : i32, i32, i32
  }
  func.func @transform_5(%arg0: i32) -> (i32, i32, i32) {
    %c0_i32 = arith.constant 0 : i32
    %c0_i32_0 = arith.constant 0 : i32
    %c0_i32_1 = arith.constant 0 : i32
    %c0_i32_2 = arith.constant 0 : i32
    return %c0_i32, %c0_i32_0, %c0_i32_1 : i32, i32, i32
  }
  func.func @transform_6(%arg0: i32) -> (i32, i32) {
    %c0_i32 = arith.constant 0 : i32
    %c0_i32_0 = arith.constant 0 : i32
    return %arg0, %c0_i32 : i32, i32
  }
}

</mosaic_0001>

<bundles_post_ra>
// kernel: tpu_custom_call.1
= control target key start
LH: loop header
LB: loop body
LE: loop exit
PB: predicated region body
PF: predicated region fallthrough
CT: control target
= control target key end

     0   :  { %11 = vsyncpa [#allocation3], 0  ;;  %s3442_s0 = inlined_call_operand.hbm [shape: f32[16,32], index: 0, kind: input, shape index: {}]   ;;  %s3443_s1 = inlined_call_operand.hbm [shape: f32[16,16], index: 1, kind: input, shape index: {}]   ;;  %s3444_s2 = inlined_call_operand.hbm [shape: f32[2,1,32], index: 2, kind: input, shape index: {}]   ;;  %s3445_s3 = inlined_call_operand.vmem [shape: f32[2,1,32], index: 3, kind: input, shape index: {}]   ;;  %s3446_s4 = inlined_call_operand.hbm [shape: f32[2,32,96], index: 4, kind: input, shape index: {}]   ;;  %s3447_s5 = inlined_call_operand.hbm [shape: f32[2,32,32], index: 5, kind: input, shape index: {}]   ;;  %s3448_s6 = inlined_call_operand.hbm [shape: f32[16,32], index: 6, kind: output, shape index: {}]  }
   0x1   :  { %12 = vsyncpa [#allocation6], 0 }
   0x2   :  { %13 = vsyncpa [#allocation9], 0 }
   0x3   :  { %14 = vsyncpa [#allocation4], 0  ;;  %s32_s23 = sshll.u32 %s3443_s1, 4  ;;  %s2624_s24 = smov [#allocation5]   ;;  %s33_s23 = int_to_ptr.hbm [resolvable:$true] %s32_s23 }
   0x4   :  { %s34_s25 = sshll.u32 %s2624_s24, 4  ;;  %s60_s28 = sshll.u32 %s3446_s4, 4  ;;  %s35_s25 = int_to_ptr.vmem [resolvable:$true] %s34_s25  ;;  %s61_s28 = int_to_ptr.hbm [resolvable:$true] %s60_s28 }
   0x5   :  { %s3449_s29 = smov 128   ;;  %s3450_s30 = smov 8  }
   0x6   :  { %40 = dma.hbm_to_vmem [thread:$0]  %s33_s23, 256, %s35_s25, [#allocation6], %s3449_s29, %s3449_s29, %s3450_s30  }
   0x7   :  { %s2627_s7 = smov [#allocation8]   ;;  %s19_s1 = sshll.u32 %s3442_s0, 4  ;;  %s20_s1 = int_to_ptr.hbm [resolvable:$true] %s19_s1 }
   0x8   :  { %s62_s8 = sshll.u32 %s2627_s7, 4  ;;  %s45_s12 = sshll.u32 %s3444_s2, 4  ;;  %s63_s8 = int_to_ptr.vmem [resolvable:$true] %s62_s8  ;;  %s46_s12 = int_to_ptr.hbm [resolvable:$true] %s45_s12 }
   0x9   :  { %68 = dma.hbm_to_vmem [thread:$0]  %s61_s28, 1024, %s63_s8, [#allocation9], %s3449_s29, %s3449_s29, %s3450_s30  }
   0xa   :  { %s2628_s13 = smov [#allocation2]   ;;  %s2629_s15 = smov [#allocation7]  }
   0xb   :  { %s21_s14 = sshll.u32 %s2628_s13, 4  ;;  %s47_s0 = sshll.u32 %s2629_s15, 4  ;;  %s22_s14 = int_to_ptr.vmem [resolvable:$true] %s21_s14  ;;  %s48_s0 = int_to_ptr.vmem [resolvable:$true] %s47_s0 }
   0xc   :  { %27 = dma.hbm_to_vmem [thread:$0]  %s20_s1, 256, %s22_s14, [#allocation3], %s3449_s29, %s3449_s29, %s3450_s30  }
   0xd   :  { %s2630_s16 = smov 16   ;;  %s2631_s17 = smov 1  }
   0xe   :  { %53 = dma.hbm_to_vmem [thread:$0]  %s46_s12, 32, %s48_s0, [#allocation6], %s2630_s16, %s2630_s16, %s2631_s17  }
   0xf   :  { %s73_s2 = sshll.u32 %s3447_s5, 4  ;;  %s2632_s20 = smov [#allocation10]   ;;  %s74_s2 = int_to_ptr.hbm [resolvable:$true] %s73_s2 }
  0x10   :  { %s75_s21 = sshll.u32 %s2632_s20, 4  ;;  %s76_s21 = int_to_ptr.vmem [resolvable:$true] %s75_s21 }
  0x11   :  { %81 = dma.hbm_to_vmem [thread:$0]  %s74_s2, 1024, %s76_s21, [#allocation9], %s3449_s29, %s3449_s29, %s3450_s30  }
  0x12   :  { %2616 = dma.done.wait [#allocation3], 256  }
  0x13   :  { %2617 = vsyncadd [#allocation3], 4294967040 }
  0x14   :  { %2618 = dma.done.wait [#allocation6], 288  }
  0x15   :  { %2619 = vsyncadd [#allocation6], 4294967008 }
  0x16   :  { %2620 = dma.done.wait [#allocation9], 2048  }
  0x17   :  { %2621 = vsyncadd [#allocation9], 4294965248  ;;  %vm108_vm0 = vcmask 261120   ;;  %v102_v0 = vld [vmem:[#allocation2] sm:$0xff]  ;;  %v103_v2 = vld [vmem:[#allocation2 + $0x8] sm:$0xff]  ;;  %v2633_v4 = vmov 32.0  }
  0x18   :  { %v109_v1 = vsel %vm108_vm0, %v102_v0, 0.0  ;;  %v112_v3 = vsel %vm108_vm0, %v103_v2, 0.0  ;;  %2330 = vrcp.f32 %v2633_v4  ;;  %v175_v21 = vld [vmem:[#allocation8 + $0x18] sm:$0xff]  ;;  %v174_v22 = vld [vmem:[#allocation8 + $0x10] sm:$0xff]  ;;  %v173_v23 = vld [vmem:[#allocation8 + $0x8] sm:$0xff]  ;;  %s2634_s23 = smov 96  }
  0x19   :  { %110 = vadd.xlane.f32.xlu0 %v109_v1  ;;  %194 = vmatpush.msra.mxu0 %v175_v21  ;;  %v172_v24 = vld [vmem:[#allocation8] sm:$0xff]  ;;  %v2326_v39 = vld [vmem:[#allocation7] ss:$0 sm:$0xff]  ;;  %s2635_s24 = smov 92   ;;  %s2636_s25 = smov 108   ;;  %vm211_vm8 = vcmask 31744  }
  0x1a   :  { %v2327_v43 = vld [vmem:[%s3445_s3] ss:$0 sm:$0xff]  ;;  %s2637_s26 = smov 88   ;;  %s2638_s27 = smov 84   ;;  %vm243_vm9 = vcmask 130048   ;;  %vm1047_vm12 = vcmask 64512  }
  0x1b   :  { %195 = vmatpush.msra.mxu0 %v174_v22  ;;  %s2639_s28 = smov 124   ;;  %s2640_s7 = smov 76   ;;  %vm1050_vm13 = vcmask 97280   ;;  %vm1055_vm14 = vcmask 162816   ;;  %vm1058_vm15 = vcmask 195584  }
  0x1c   :  { %s2641_s8 = smov 116   ;;  %s2642_s9 = smov 80  }
  0x1d   :  { %196 = vmatpush.msra.mxu0 %v173_v23  ;;  %s2643_s10 = smov 120   ;;  %s2644_s1 = smov 112  }
  0x1e   :  { %v2331_v5 = vpop.eup %2330  ;;  %s2645_s4 = smov 100   ;;  %s2646_s11 = smov 68  }
  0x1f   :  { %v116_v6 = vmul.f32 32.0, %v2331_v5  ;;  %vm120_vm1 = vweird.f32 %v2331_v5  ;;  %197 = vmatpush.msra.mxu0 %v172_v24  ;;  %s2647_s12 = smov 60   ;;  %s2648_s13 = smov 72  }
  0x20   :  { %s2649_s14 = smov 104   ;;  %s2650_s15 = smov 64  }
  0x21   :  { %113 = vadd.xlane.f32.xlu0 %v112_v3  ;;  %v117_v7 = vsub.f32 1.0, %v116_v6  ;;  %s2651_s0 = smov 52   ;;  %s2652_s17 = smov 44  }
  0x22   :  { %s2653_s18 = smov 56   ;;  %s2654_s19 = smov 48  }
  0x23   :  { %v118_v8 = vmul.f32 %v2331_v5, %v117_v7  ;;  %s2655_s2 = smov 40   ;;  %s2656_s20 = smov 36  }
  0x24   :  { %s2657_s21 = smov 4   ;;  %s2658_s5 = smov 20  }
  0x25   :  { %v119_v9 = vadd.f32 %v2331_v5, %v118_v8  ;;  %s3452_s22 = smov 28   ;;  %s3454_s29 = smov 24  }
  0x27   :  { %v2729_v10 = vsel %vm120_vm1, %v2331_v5, %v119_v9  ;;  %vm1061_vm1 = vcmask 228352  }
  0x8c   :  { %v111_v11 = vpop.xlane.xlu0 %110 }
  0x8d   :  { %v122_v12 = vmul.f32 %v2729_v10, %v111_v11 }
  0x8f   :  { %v124_v13 = vsub.f32 %v102_v0, %v122_v12 }
  0x91   :  { %v126_v14 = vmul.f32 %v124_v13, %v124_v13 }
  0x93   :  { %v128_v15 = vsel %vm108_vm0, %v126_v14, 0.0 }
  0x94   :  { %129 = vadd.xlane.f32.xlu1 %v128_v15  ;;  %v114_v16 = vpop.xlane.xlu0 %113 }
  0x95   :  { %v123_v17 = vmul.f32 %v2729_v10, %v114_v16 }
  0x97   :  { %v125_v18 = vsub.f32 %v103_v2, %v123_v17 }
  0x99   :  { %v127_v19 = vmul.f32 %v125_v18, %v125_v18 }
  0x9b   :  { %v131_v20 = vsel %vm108_vm0, %v127_v19, 0.0 }
  0x9c   :  { %132 = vadd.xlane.f32.xlu1 %v131_v20 }
 0x107   :  { %v130_v25 = vpop.xlane.xlu1 %129 }
 0x108   :  { %v134_v26 = vmul.f32 %v130_v25, %v2729_v10 }
 0x10a   :  { %v136_v27 = vadd.f32 1e-05, %v134_v26 }
 0x10c   :  { %2332 = vrsqrt.f32 %v136_v27  ;;  %vm144_vm3 = vweird.f32 %v136_v27 }
 0x10f   :  { %v133_v28 = vpop.xlane.xlu1 %132 }
 0x110   :  { %v135_v29 = vmul.f32 %v133_v28, %v2729_v10 }
 0x112   :  { %v2333_v30 = vpop.eup %2332  ;;  %v137_v31 = vadd.f32 1e-05, %v135_v29  ;;  %v2812_v29 = vld [vmem:[#allocation5] sm:$0xff] }
 0x113   :  { %v139_v32 = vmul.f32 %v2333_v30, %v136_v27  ;;  %vm145_vm2 = vweird.f32 %v2333_v30  ;;  %vm106_vm10 = vcmp.eq.f32.partialorder %v2812_v29, 0.0 }
 0x114   :  { %2334 = vrsqrt.f32 %v137_v31  ;;  %vm146_vm4 = vmor %vm144_vm3, %vm145_vm2  ;;  %vm154_vm6 = vweird.f32 %v137_v31 }
 0x115   :  { %v140_v33 = vmul.f32 %v2333_v30, %v139_v32 }
 0x117   :  { %v141_v34 = vmul.f32 0.5, %v140_v33  ;;  %v2819_v33 = vld [vmem:[#allocation5 + $0x8] sm:$0xff] }
 0x118   :  { %vm107_vm11 = vcmp.eq.f32.partialorder %v2819_v33, 0.0 }
 0x119   :  { %v142_v35 = vsub.f32 1.5, %v141_v34 }
 0x11a   :  { %v2335_v36 = vpop.eup %2334 }
 0x11b   :  { %v143_v37 = vmul.f32 %v2333_v30, %v142_v35  ;;  %v149_v38 = vmul.f32 %v2335_v36, %v137_v31  ;;  %vm155_vm5 = vweird.f32 %v2335_v36 }
 0x11c   :  { %vm156_vm7 = vmor %vm154_vm6, %vm155_vm5 }
 0x11d   :  { %v150_v40 = vmul.f32 %v2335_v36, %v149_v38  ;;  %v147_v41 = vsel %vm146_vm4, %v2333_v30, %v143_v37 }
 0x11e   :  { %v158_v42 = vmul.f32 %v147_v41, %v124_v13 }
 0x11f   :  { %v151_v44 = vmul.f32 0.5, %v150_v40 }
 0x120   :  { %v164_v45 = vmul.f32 %v2326_v39, %v158_v42 }
 0x121   :  { %v152_v46 = vsub.f32 1.5, %v151_v44 }
 0x122   :  { %v170_v47 = vadd.f32 %v2327_v43, %v164_v45 }
 0x123   :  { %v153_v48 = vmul.f32 %v2335_v36, %v152_v46 }
 0x124   :  { %2102 = vmatmul.msk.f32.vlgmr.msra.gmra.mxu0 %vm108_vm0, %v170_v47 }
 0x125   :  { %v157_v49 = vsel %vm156_vm7, %v2335_v36, %v153_v48 }
 0x126   :  { %v159_v50 = vmul.f32 %v157_v49, %v125_v18 }
 0x128   :  { %v165_v51 = vmul.f32 %v2326_v39, %v159_v50 }
 0x12a   :  { %v171_v52 = vadd.f32 %v2327_v43, %v165_v51 }
 0x12c   :  { %2103 = vmatmul.msk.f32.gmra.mxu0 %vm108_vm0, %v171_v52 }
 0x1a1   :  { %v199_v53 = vpop.f32.mrf.mxu0 }
 0x1a2   :  { %207 = vrot.lane.b32.xlu2 %v199_v53, %s2634_s23  ;;  %307 = vrot.lane.b32.xlu1 %v199_v53, %s2635_s24 }
 0x1a9   :  { %v202_v54 = vpop.f32.mrf.mxu0 }
 0x1aa   :  { %695 = vrot.lane.b32.xlu1 %v199_v53, %s2636_s25  ;;  %309 = vrot.lane.b32.xlu0 %v202_v54, %s2635_s24  ;;  %v2765_v55 = vpack.i.bf16 %v199_v53, %v202_v54 }
 0x1ab   :  { %209 = vrot.lane.b32.xlu2 %v202_v54, %s2634_s23 }
 0x1b2   :  { %407 = vrot.lane.b32.xlu1 %v202_v54, %s2637_s26  ;;  %503 = vrot.lane.b32.xlu0 %v199_v53, %s2638_s27 }
 0x1b3   :  { %303 = vrot.lane.b32.xlu2 %v199_v53, %s2639_s28 }
 0x1ba   :  { %701 = vrot.lane.b32.xlu1 %v202_v54, %s2640_s7  ;;  %405 = vrot.lane.b32.xlu0 %v199_v53, %s2637_s26 }
 0x1bb   :  { %499 = vrot.lane.b32.xlu2 %v199_v53, %s2641_s8 }
 0x1c2   :  { %601 = vrot.lane.b32.xlu1 %v199_v53, %s2642_s9  ;;  %401 = vrot.lane.b32.xlu0 %v199_v53, %s2643_s10 }
 0x1c3   :  { %305 = vrot.lane.b32.xlu2 %v202_v54, %s2639_s28 }
 0x1ca   :  { %597 = vrot.lane.b32.xlu1 %v199_v53, %s2644_s1  ;;  %403 = vrot.lane.b32.xlu0 %v202_v54, %s2643_s10 }
 0x1cb   :  { %505 = vrot.lane.b32.xlu2 %v202_v54, %s2638_s27 }
 0x1d2   :  { %599 = vrot.lane.b32.xlu1 %v202_v54, %s2644_s1  ;;  %697 = vrot.lane.b32.xlu0 %v202_v54, %s2636_s25 }
 0x1d3   :  { %699 = vrot.lane.b32.xlu2 %v199_v53, %s2640_s7 }
 0x1da   :  { %893 = vrot.lane.b32.xlu1 %v202_v54, %s2645_s4  ;;  %895 = vrot.lane.b32.xlu0 %v199_v53, %s2646_s11 }
 0x1db   :  { %501 = vrot.lane.b32.xlu2 %v202_v54, %s2641_s8 }
 0x1e2   :  { %2252 = vrot.lane.b32.xlu1 %v2765_v55, %s2647_s12  ;;  %799 = vrot.lane.b32.xlu0 %v202_v54, %s2648_s13 }
 0x1e3   :  { %603 = vrot.lane.b32.xlu2 %v202_v54, %s2642_s9 }
 0x1ea   :  { %793 = vrot.lane.b32.xlu0 %v199_v53, %s2649_s14 }
 0x1eb   :  { %897 = vrot.lane.b32.xlu2 %v202_v54, %s2646_s11 }
 0x1f2   :  { %2247 = vrot.lane.b32.xlu0 %v2765_v55, %s2650_s15 }
 0x1f3   :  { %891 = vrot.lane.b32.xlu2 %v199_v53, %s2645_s4 }
 0x1fb   :  { %797 = vrot.lane.b32.xlu2 %v199_v53, %s2648_s13 }
 0x1fc   :  { %v208_v56 = vpop.permute.xlu2 %207 }
 0x203   :  { %795 = vrot.lane.b32.xlu2 %v202_v54, %s2649_s14 }
 0x205   :  { %v210_v57 = vpop.permute.xlu2 %209 }
 0x206   :  { %2104 = vmatpush.xpose.msk.msra.mxu1 %vm211_vm8, %v210_v57 }
 0x20a   :  { %2105 = vmatpush.xpose.msk.msra.mxu1 %vm211_vm8, %v208_v56 }
 0x20b   :  { %2257 = vrot.lane.b32.xlu2 %v2765_v55, %s2651_s0 }
 0x20d   :  { %2106 = vmatmul.msk.f32.vlgmr.msra.gmra.mxu1 %vm211_vm8, %v199_v53  ;;  %v304_v58 = vpop.permute.xlu2 %303 }
 0x214   :  { %v308_v59 = vpop.permute.xlu1 %307 }
 0x215   :  { %2107 = vmatmul.msk.f32.gmra.mxu1 %vm211_vm8, %v202_v54  ;;  %v500_v60 = vpop.permute.xlu2 %499 }
 0x21c   :  { %v310_v61 = vpop.permute.xlu0 %309  ;;  %v696_v62 = vpop.permute.xlu1 %695 }
 0x21d   :  { %v306_v63 = vpop.permute.xlu2 %305  ;;  %2110 = vmatpush.xpose.msk.msra.mxu3 %vm211_vm8, %v310_v61 }
 0x221   :  { %2111 = vmatpush.xpose.msk.msra.mxu3 %vm211_vm8, %v308_v59 }
 0x224   :  { %v504_v0 = vpop.permute.xlu0 %503  ;;  %2112 = vmatmul.msk.f32.vlgmr.msra.gmra.mxu3 %vm211_vm8, %v304_v58  ;;  %v408_v1 = vpop.permute.xlu1 %407 }
 0x225   :  { %v506_v2 = vpop.permute.xlu2 %505  ;;  %2116 = vmatpush.xpose.msk.msrb.mxu0 %vm211_vm8, %v408_v1 }
 0x226   :  { %2122 = vmatpush.xpose.msk.msrb.mxu3 %vm211_vm8, %v506_v2 }
 0x22a   :  { %2123 = vmatpush.xpose.msk.msrb.mxu3 %vm211_vm8, %v504_v0 }
 0x22c   :  { %v406_v3 = vpop.permute.xlu0 %405  ;;  %2113 = vmatmul.msk.f32.gmra.mxu3 %vm211_vm8, %v306_v63  ;;  %v702_v4 = vpop.permute.xlu1 %701 }
 0x22d   :  { %v700_v5 = vpop.permute.xlu2 %699  ;;  %2117 = vmatpush.xpose.msk.msrb.mxu0 %vm211_vm8, %v406_v3 }
 0x22e   :  { %2134 = vmatpush.xpose.msk.msra.mxu3 %vm211_vm8, %v702_v4 }
 0x232   :  { %2135 = vmatpush.xpose.msk.msra.mxu3 %vm211_vm8, %v700_v5 }
 0x234   :  { %v402_v6 = vpop.permute.xlu0 %401  ;;  %2124 = vmatmul.msk.f32.vlgmr.msrb.gmra.mxu3 %vm211_vm8, %v500_v60  ;;  %v602_v8 = vpop.permute.xlu1 %601 }
 0x235   :  { %v502_v7 = vpop.permute.xlu2 %501  ;;  %2118 = vmatmul.msk.f32.vlgmr.msrb.gmra.mxu0 %vm211_vm8, %v402_v6 }
 0x23c   :  { %v404_v9 = vpop.permute.xlu0 %403  ;;  %2125 = vmatmul.msk.f32.gmra.mxu3 %vm211_vm8, %v502_v7  ;;  %v598_v12 = vpop.permute.xlu1 %597 }
 0x23d   :  { %v604_v11 = vpop.permute.xlu2 %603  ;;  %2119 = vmatmul.msk.f32.gmra.mxu0 %vm211_vm8, %v404_v9 }
 0x23e   :  { %2128 = vmatpush.xpose.msk.msra.mxu0 %vm211_vm8, %v604_v11 }
 0x242   :  { %2129 = vmatpush.xpose.msk.msra.mxu0 %vm211_vm8, %v602_v8 }
 0x244   :  { %v698_v13 = vpop.permute.xlu0 %697  ;;  %2136 = vmatmul.msk.f32.vlgmr.msra.gmra.mxu3 %vm211_vm8, %v696_v62  ;;  %v600_v15 = vpop.permute.xlu1 %599 }
 0x245   :  { %v898_v14 = vpop.permute.xlu2 %897  ;;  %2130 = vmatmul.msk.f32.vlgmr.msra.gmra.mxu0 %vm211_vm8, %v598_v12 }
 0x246   :  { %2146 = vmatpush.xpose.msk.msrb.mxu3 %vm211_vm8, %v898_v14 }
 0x24c   :  { %v896_v16 = vpop.permute.xlu0 %895  ;;  %2137 = vmatmul.msk.f32.gmra.mxu3 %vm211_vm8, %v698_v13  ;;  %v894_v20 = vpop.permute.xlu1 %893 }
 0x24d   :  { %2131 = vmatmul.msk.f32.gmra.mxu0 %vm211_vm8, %v600_v15  ;;  %2147 = vmatpush.xpose.msk.msrb.mxu3 %vm211_vm8, %v896_v16  ;;  %v892_v17 = vpop.permute.xlu2 %891 }
 0x254   :  { %v800_v18 = vpop.permute.xlu0 %799  ;;  %2148 = vmatmul.msk.f32.vlgmr.msrb.gmra.mxu3 %vm211_vm8, %v892_v17  ;;  %v2253_v24 = vpop.permute.xlu1 %2252 }
 0x255   :  { %2140 = vmatpush.xpose.msk.msrb.mxu0 %vm211_vm8, %v800_v18  ;;  %v798_v19 = vpop.permute.xlu2 %797  ;;  %v2254_v27 = vunpack.i.l.bf16 %v2253_v24  ;;  %v2255_v28 = vunpack.i.h.bf16 %v2253_v24 }
 0x259   :  { %2141 = vmatpush.xpose.msk.msrb.mxu0 %vm211_vm8, %v798_v19 }
 0x25c   :  { %v794_v21 = vpop.permute.xlu0 %793  ;;  %2149 = vmatmul.msk.f32.gmra.mxu3 %vm211_vm8, %v894_v20 }
 0x25d   :  { %2142 = vmatmul.msk.f32.vlgmr.msrb.gmra.mxu0 %vm211_vm8, %v794_v21  ;;  %v796_v22 = vpop.permute.xlu2 %795 }
 0x264   :  { %v2248_v23 = vpop.permute.xlu0 %2247 }
 0x265   :  { %2143 = vmatmul.msk.f32.gmra.mxu0 %vm211_vm8, %v796_v22  ;;  %v2249_v25 = vunpack.i.l.bf16 %v2248_v23  ;;  %v2250_v26 = vunpack.i.h.bf16 %v2248_v23 }
 0x267   :  { %294 = vmatpush.msra.mxu2 %v2249_v25 }
 0x269   :  { %295 = vmatpush.msra.mxu2 %v2250_v26 }
 0x26b   :  { %392 = vmatpush.msrb.mxu2 %v2254_v27  ;;  %v2910_v27 = vpop.permute.xlu2 %2257 }
 0x26d   :  { %393 = vmatpush.msrb.mxu2 %v2255_v28 }
 0x28a   :  { %v237_v30 = vpop.f32.mrf.mxu1 }
 0x28b   :  { %v2815_v31 = vadd.f32 %v237_v30, %v2812_v29 }
 0x28d   :  { %v244_v32 = vsel %vm243_vm9, %v2815_v31, -inf }
 0x28e   :  { %245 = vmax.xlane.f32.xlu1 %v244_v32 }
 0x292   :  { %v240_v34 = vpop.f32.mrf.mxu1 }
 0x293   :  { %v2822_v35 = vadd.f32 %v240_v34, %v2819_v33 }
 0x295   :  { %v247_v36 = vsel %vm243_vm9, %v2822_v35, -inf }
 0x296   :  { %248 = vmax.xlane.f32.xlu0 %v247_v36 }
 0x2a7   :  { %v336_v37 = vpop.f32.mrf.mxu3 }
 0x2a8   :  { %v2837_v44 = vadd.f32 %v336_v37, %v2812_v29 }
 0x2aa   :  { %v342_v49 = vsel %vm243_vm9, %v2837_v44, -inf }
 0x2af   :  { %v339_v38 = vpop.f32.mrf.mxu3 }
 0x2b0   :  { %v2827_v39 = vadd.f32 %v339_v38, %v2819_v33 }
 0x2b2   :  { %v434_v40 = vpop.f32.mrf.mxu0  ;;  %v345_v41 = vsel %vm243_vm9, %v2827_v39, -inf }
 0x2b3   :  { %v2832_v42 = vadd.f32 %v434_v40, %v2812_v29  ;;  %346 = vmax.xlane.f32.xlu1 %v345_v41 }
 0x2b5   :  { %v440_v43 = vsel %vm243_vm9, %v2832_v42, -inf }
 0x2b6   :  { %441 = vmax.xlane.f32.xlu2 %v440_v43 }
 0x2b7   :  { %v532_v45 = vpop.f32.mrf.mxu3 }
 0x2b8   :  { %v2852_v54 = vadd.f32 %v532_v45, %v2812_v29 }
 0x2ba   :  { %v437_v46 = vpop.f32.mrf.mxu0  ;;  %v538_v58 = vsel %vm243_vm9, %v2852_v54, -inf }
 0x2bb   :  { %v2840_v47 = vadd.f32 %v437_v46, %v2819_v33 }
 0x2bd   :  { %v443_v48 = vsel %vm243_vm9, %v2840_v47, -inf }
 0x2be   :  { %444 = vmax.xlane.f32.xlu0 %v443_v48  ;;  %343 = vmax.xlane.f32.xlu2 %v342_v49 }
 0x2bf   :  { %v535_v52 = vpop.f32.mrf.mxu3 }
 0x2c0   :  { %v2881_v8 = vadd.f32 %v535_v52, %v2819_v33 }
 0x2c2   :  { %v630_v50 = vpop.f32.mrf.mxu0  ;;  %v541_v11 = vsel %vm243_vm9, %v2881_v8, -inf }
 0x2c3   :  { %v2847_v51 = vadd.f32 %v630_v50, %v2812_v29 }
 0x2c5   :  { %v636_v53 = vsel %vm243_vm9, %v2847_v51, -inf }
 0x2c6   :  { %637 = vmax.xlane.f32.xlu0 %v636_v53 }
 0x2c7   :  { %v728_v60 = vpop.f32.mrf.mxu3 }
 0x2c8   :  { %v2864_v61 = vadd.f32 %v728_v60, %v2812_v29 }
 0x2ca   :  { %v633_v56 = vpop.f32.mrf.mxu0  ;;  %v734_v62 = vsel %vm243_vm9, %v2864_v61, -inf }
 0x2cb   :  { %v2855_v57 = vadd.f32 %v633_v56, %v2819_v33 }
 0x2cc   :  { %2267 = vrot.lane.b32.xlu1 %v2765_v55, %s2652_s17 }
 0x2cd   :  { %v639_v59 = vsel %vm243_vm9, %v2855_v57, -inf }
 0x2ce   :  { %539 = vmax.xlane.f32.xlu0 %v538_v58  ;;  %640 = vmax.xlane.f32.xlu2 %v639_v59 }
 0x2cf   :  { %v731_v63 = vpop.f32.mrf.mxu3 }
 0x2d0   :  { %v2876_v5 = vadd.f32 %v731_v63, %v2819_v33 }
 0x2d2   :  { %v737_v6 = vsel %vm243_vm9, %v2876_v5, -inf }
 0x2d6   :  { %735 = vmax.xlane.f32.xlu2 %v734_v62 }
 0x2d7   :  { %v924_v3 = vpop.f32.mrf.mxu3 }
 0x2d8   :  { %v2896_v15 = vadd.f32 %v924_v3, %v2812_v29 }
 0x2da   :  { %v826_v0 = vpop.f32.mrf.mxu0  ;;  %v930_v19 = vsel %vm243_vm9, %v2896_v15, -inf }
 0x2db   :  { %v2891_v13 = vadd.f32 %v826_v0, %v2812_v29 }
 0x2dd   :  { %v832_v14 = vsel %vm243_vm9, %v2891_v13, -inf }
 0x2df   :  { %v927_v7 = vpop.f32.mrf.mxu3 }
 0x2e0   :  { %v2884_v9 = vadd.f32 %v927_v7, %v2819_v33 }
 0x2e2   :  { %2262 = vrot.lane.b32.xlu0 %v2765_v55, %s2653_s18  ;;  %v829_v1 = vpop.f32.mrf.mxu0  ;;  %v933_v12 = vsel %vm243_vm9, %v2884_v9, -inf }
 0x2e3   :  { %v2871_v2 = vadd.f32 %v829_v1, %v2819_v33 }
 0x2e5   :  { %v835_v4 = vsel %vm243_vm9, %v2871_v2, -inf }
 0x2e6   :  { %836 = vmax.xlane.f32.xlu2 %v835_v4 }
 0x2ee   :  { %738 = vmax.xlane.f32.xlu2 %v737_v6 }
 0x2f6   :  { %542 = vmax.xlane.f32.xlu1 %v541_v11  ;;  %934 = vmax.xlane.f32.xlu2 %v933_v12 }
 0x2fe   :  { %833 = vmax.xlane.f32.xlu1 %v832_v14 }
 0x301   :  { %v246_v16 = vpop.xlane.xlu1 %245 }
 0x302   :  { %v250_v17 = vsub.f32 %v2815_v31, %v246_v16 }
 0x304   :  { %v252_v18 = vmul.f32 1.442695, %v250_v17 }
 0x306   :  { %2336 = vpow2.f32 %v252_v18  ;;  %931 = vmax.xlane.f32.xlu1 %v930_v19 }
 0x309   :  { %v249_v20 = vpop.xlane.xlu0 %248 }
 0x30a   :  { %v251_v21 = vsub.f32 %v2822_v35, %v249_v20 }
 0x30c   :  { %v2902_v22 = vpop.eup %2336  ;;  %v254_v23 = vmul.f32 1.442695, %v251_v21 }
 0x30d   :  { %v256_v24 = vsel %vm243_vm9, %v2902_v22, 0.0 }
 0x30e   :  { %2338 = vpow2.f32 %v254_v23  ;;  %257 = vadd.xlane.f32.xlu1 %v256_v24 }
 0x314   :  { %v2906_v25 = vpop.eup %2338 }
 0x315   :  { %v259_v26 = vsel %vm243_vm9, %v2906_v25, 0.0 }
 0x316   :  { %260 = vadd.xlane.f32.xlu1 %v259_v26 }
 0x326   :  { %v347_v32 = vpop.xlane.xlu1 %346 }
 0x327   :  { %v349_v40 = vsub.f32 %v2827_v39, %v347_v32 }
 0x329   :  { %v442_v28 = vpop.xlane.xlu2 %441 }
 0x32a   :  { %v446_v30 = vsub.f32 %v2832_v42, %v442_v28  ;;  %v352_v42 = vmul.f32 1.442695, %v349_v40 }
 0x32c   :  { %v448_v31 = vmul.f32 1.442695, %v446_v30 }
 0x32e   :  { %2340 = vpow2.f32 %v448_v31 }
 0x331   :  { %v445_v34 = vpop.xlane.xlu0 %444  ;;  %v344_v35 = vpop.xlane.xlu2 %343 }
 0x332   :  { %v447_v36 = vsub.f32 %v2840_v47, %v445_v34  ;;  %v348_v37 = vsub.f32 %v2837_v44, %v344_v35 }
 0x334   :  { %v2915_v38 = vpop.eup %2340  ;;  %v450_v41 = vmul.f32 1.442695, %v447_v36  ;;  %v350_v43 = vmul.f32 1.442695, %v348_v37 }
 0x335   :  { %v452_v45 = vsel %vm243_vm9, %v2915_v38, 0.0 }
 0x336   :  { %2342 = vpow2.f32 %v450_v41  ;;  %453 = vadd.xlane.f32.xlu2 %v452_v45 }
 0x337   :  { %2344 = vpow2.f32 %v350_v43 }
 0x338   :  { %2346 = vpow2.f32 %v352_v42 }
 0x339   :  { %v638_v46 = vpop.xlane.xlu0 %637 }
 0x33a   :  { %v642_v48 = vsub.f32 %v2847_v51, %v638_v46 }
 0x33c   :  { %v2921_v49 = vpop.eup %2342  ;;  %v644_v44 = vmul.f32 1.442695, %v642_v48 }
 0x33d   :  { %v2923_v47 = vpop.eup %2344  ;;  %v455_v39 = vsel %vm243_vm9, %v2921_v49, 0.0 }
 0x33e   :  { %2348 = vpow2.f32 %v644_v44  ;;  %456 = vadd.xlane.f32.xlu0 %v455_v39  ;;  %v354_v50 = vsel %vm243_vm9, %v2923_v47, 0.0  ;;  %v2929_v56 = vpop.eup %2346  ;;  %v2952_v18 = vpop.permute.xlu1 %2267 }
 0x33f   :  { %355 = vadd.xlane.f32.xlu2 %v354_v50  ;;  %v357_v63 = vsel %vm243_vm9, %v2929_v56, 0.0 }
 0x341   :  { %v540_v52 = vpop.xlane.xlu0 %539  ;;  %v641_v53 = vpop.xlane.xlu2 %640 }
 0x342   :  { %v544_v51 = vsub.f32 %v2852_v54, %v540_v52  ;;  %v643_v60 = vsub.f32 %v2855_v57, %v641_v53  ;;  %v2259_v52 = vunpack.i.l.bf16 %v2910_v27 }
 0x344   :  { %v2932_v58 = vpop.eup %2348  ;;  %v546_v59 = vmul.f32 1.442695, %v544_v51  ;;  %v646_v0 = vmul.f32 1.442695, %v643_v60  ;;  %v2260_v51 = vunpack.i.h.bf16 %v2910_v27 }
 0x345   :  { %v648_v62 = vsel %vm243_vm9, %v2932_v58, 0.0 }
 0x346   :  { %2350 = vpow2.f32 %v546_v59  ;;  %649 = vadd.xlane.f32.xlu1 %v648_v62  ;;  %358 = vadd.xlane.f32.xlu0 %v357_v63 }
 0x347   :  { %2352 = vpow2.f32 %v646_v0 }
 0x349   :  { %v736_v1 = vpop.xlane.xlu2 %735 }
 0x34a   :  { %v740_v54 = vsub.f32 %v2864_v61, %v736_v1 }
 0x34c   :  { %v2939_v3 = vpop.eup %2350  ;;  %v742_v57 = vmul.f32 1.442695, %v740_v54 }
 0x34d   :  { %v550_v4 = vsel %vm243_vm9, %v2939_v3, 0.0  ;;  %v2944_v6 = vpop.eup %2352 }
 0x34e   :  { %551 = vadd.xlane.f32.xlu2 %v550_v4  ;;  %2354 = vpow2.f32 %v742_v57  ;;  %v651_v11 = vsel %vm243_vm9, %v2944_v6, 0.0 }
 0x354   :  { %v2263_v7 = vpop.permute.xlu0 %2262  ;;  %v2948_v17 = vpop.eup %2354 }
 0x355   :  { %v2264_v12 = vunpack.i.l.bf16 %v2263_v7  ;;  %v2265_v14 = vunpack.i.h.bf16 %v2263_v7  ;;  %v746_v61 = vsel %vm243_vm9, %v2948_v17, 0.0 }
 0x356   :  { %652 = vadd.xlane.f32.xlu2 %v651_v11 }
 0x357   :  { %490 = vmatpush.msrb.mxu1 %v2264_v12 }
 0x359   :  { %491 = vmatpush.msrb.mxu1 %v2265_v14  ;;  %v837_v16 = vpop.xlane.xlu2 %836 }
 0x35a   :  { %v839_v21 = vsub.f32 %v2871_v2, %v837_v16  ;;  %v2269_v16 = vunpack.i.l.bf16 %v2952_v18 }
 0x35c   :  { %v842_v24 = vmul.f32 1.442695, %v839_v21 }
 0x35e   :  { %747 = vadd.xlane.f32.xlu2 %v746_v61 }
 0x361   :  { %v739_v19 = vpop.xlane.xlu2 %738 }
 0x362   :  { %v741_v20 = vsub.f32 %v2876_v5, %v739_v19  ;;  %v2270_v19 = vunpack.i.h.bf16 %v2952_v18 }
 0x364   :  { %v744_v23 = vmul.f32 1.442695, %v741_v20 }
 0x366   :  { %2356 = vpow2.f32 %v744_v23 }
 0x367   :  { %2358 = vpow2.f32 %v842_v24 }
 0x369   :  { %v935_v26 = vpop.xlane.xlu2 %934  ;;  %v543_v28 = vpop.xlane.xlu1 %542 }
 0x36a   :  { %v545_v30 = vsub.f32 %v2881_v8, %v543_v28  ;;  %v937_v32 = vsub.f32 %v2884_v9, %v935_v26 }
 0x36c   :  { %v2957_v31 = vpop.eup %2356  ;;  %v548_v34 = vmul.f32 1.442695, %v545_v30  ;;  %v940_v5 = vmul.f32 1.442695, %v937_v32 }
 0x36d   :  { %v749_v35 = vsel %vm243_vm9, %v2957_v31, 0.0  ;;  %v2962_v36 = vpop.eup %2358 }
 0x36e   :  { %750 = vadd.xlane.f32.xlu0 %v749_v35  ;;  %2360 = vpow2.f32 %v548_v34  ;;  %v847_v8 = vsel %vm243_vm9, %v2962_v36, 0.0 }
 0x36f   :  { %2362 = vpow2.f32 %v940_v5 }
 0x371   :  { %v834_v2 = vpop.xlane.xlu1 %833 }
 0x372   :  { %v838_v27 = vsub.f32 %v2891_v13, %v834_v2 }
 0x374   :  { %v2964_v37 = vpop.eup %2360  ;;  %v840_v63 = vmul.f32 1.442695, %v838_v27 }
 0x375   :  { %v553_v9 = vsel %vm243_vm9, %v2964_v37, 0.0  ;;  %v2970_v41 = vpop.eup %2362 }
 0x376   :  { %848 = vadd.xlane.f32.xlu0 %v847_v8  ;;  %554 = vadd.xlane.f32.xlu1 %v553_v9  ;;  %v945_v42 = vsel %vm243_vm9, %v2970_v41, 0.0 }
 0x379   :  { %v932_v40 = vpop.xlane.xlu1 %931 }
 0x37a   :  { %v936_v43 = vsub.f32 %v2896_v15, %v932_v40 }
 0x37c   :  { %v938_v45 = vmul.f32 1.442695, %v936_v43 }
 0x37e   :  { %2364 = vpow2.f32 %v938_v45  ;;  %946 = vadd.xlane.f32.xlu0 %v945_v42 }
 0x381   :  { %v258_v46 = vpop.xlane.xlu1 %257 }
 0x382   :  { %2366 = vrcp.f32 %v258_v46 }
 0x384   :  { %v2975_v48 = vpop.eup %2364 }
 0x385   :  { %v942_v44 = vsel %vm243_vm9, %v2975_v48, 0.0 }
 0x386   :  { %943 = vadd.xlane.f32.xlu2 %v942_v44 }
 0x388   :  { %v2367_v39 = vpop.eup %2366 }
 0x389   :  { %v261_v50 = vpop.xlane.xlu1 %260  ;;  %v264_v15 = vmul.f32 %v2367_v39, %v2902_v22 }
 0x38a   :  { %2368 = vrcp.f32 %v261_v50 }
 0x38b   :  { %v266_v53 = vsel %vm106_vm10, %v264_v15, 0.0 }
 0x38c   :  { %2108 = vmatmul.msk.f32.vlgmr.msra.gmra.mxu2 %vm243_vm9, %v266_v53 }
 0x38d   :  { %588 = vmatpush.msra.mxu2 %v2259_v52 }
 0x38f   :  { %589 = vmatpush.msra.mxu2 %v2260_v51  ;;  %2272 = vrot.lane.b32.xlu1 %v2765_v55, %s2654_s19 }
 0x390   :  { %v2369_v59 = vpop.eup %2368 }
 0x391   :  { %v265_v22 = vmul.f32 %v2369_v59, %v2906_v25 }
 0x392   :  { %2282 = vrot.lane.b32.xlu0 %v2765_v55, %s2655_s2 }
 0x393   :  { %v267_v60 = vsel %vm107_vm11, %v265_v22, 0.0 }
 0x394   :  { %2109 = vmatmul.msk.f32.gmra.mxu2 %vm243_vm9, %v267_v60 }
 0x39e   :  { %2277 = vrot.lane.b32.xlu2 %v2765_v55, %s2656_s20 }
 0x3a9   :  { %v454_v62 = vpop.xlane.xlu2 %453 }
 0x3aa   :  { %2370 = vrcp.f32 %v454_v62 }
 0x3ab   :  { %2372 = vpow2.f32 %v840_v63 }
 0x3b0   :  { %v2371_v0 = vpop.eup %2370 }
 0x3b1   :  { %v457_v25 = vpop.xlane.xlu0 %456  ;;  %v460_v1 = vmul.f32 %v2371_v0, %v2915_v38  ;;  %v3002_v57 = vpop.eup %2372 }
 0x3b2   :  { %2374 = vrcp.f32 %v457_v25  ;;  %v356_v54 = vpop.xlane.xlu2 %355  ;;  %v844_v11 = vsel %vm243_vm9, %v3002_v57, 0.0 }
 0x3b3   :  { %2376 = vrcp.f32 %v356_v54  ;;  %v462_v4 = vsel %vm106_vm10, %v460_v1, 0.0 }
 0x3b4   :  { %2120 = vmatmul.msk.f32.vlgmr.msrb.gmra.mxu1 %vm243_vm9, %v462_v4 }
 0x3b8   :  { %v2375_v55 = vpop.eup %2374 }
 0x3b9   :  { %v2377_v13 = vpop.eup %2376  ;;  %v359_v7 = vpop.xlane.xlu0 %358  ;;  %v461_v12 = vmul.f32 %v2375_v55, %v2921_v49  ;;  %845 = vadd.xlane.f32.xlu1 %v844_v11 }
 0x3ba   :  { %2378 = vrcp.f32 %v359_v7  ;;  %v362_v38 = vmul.f32 %v2377_v13, %v2923_v47  ;;  %v650_v18 = vpop.xlane.xlu1 %649 }
 0x3bb   :  { %v463_v14 = vsel %vm107_vm11, %v461_v12, 0.0 }
 0x3bc   :  { %v364_v61 = vsel %vm106_vm10, %v362_v38, 0.0  ;;  %2121 = vmatmul.msk.f32.gmra.mxu1 %vm243_vm9, %v463_v14 }
 0x3bd   :  { %2114 = vmatmul.msk.f32.vlgmr.msrb.gmra.mxu2 %vm243_vm9, %v364_v61 }
 0x3be   :  { %784 = vmatpush.msrb.mxu2 %v2269_v16 }
 0x3c0   :  { %v2379_v49 = vpop.eup %2378  ;;  %785 = vmatpush.msrb.mxu2 %v2270_v19 }
 0x3c1   :  { %v552_v20 = vpop.xlane.xlu2 %551  ;;  %v363_v47 = vmul.f32 %v2379_v49, %v2929_v56 }
 0x3c2   :  { %2380 = vrcp.f32 %v552_v20 }
 0x3c3   :  { %v365_v21 = vsel %vm107_vm11, %v363_v47, 0.0 }
 0x3c5   :  { %2115 = vmatmul.msk.f32.gmra.mxu2 %vm243_vm9, %v365_v21 }
 0x3c8   :  { %v2381_v23 = vpop.eup %2380 }
 0x3c9   :  { %v558_v24 = vmul.f32 %v2381_v23, %v2939_v3  ;;  %v653_v28 = vpop.xlane.xlu2 %652 }
 0x3cb   :  { %v560_v26 = vsel %vm106_vm10, %v558_v24, 0.0 }
 0x3cd   :  { %2126 = vmatmul.msk.f32.vlgmr.msra.gmra.mxu2 %vm243_vm9, %v560_v26 }
 0x3d1   :  { %v748_v56 = vpop.xlane.xlu2 %747 }
 0x3e1   :  { %v751_v30 = vpop.xlane.xlu0 %750 }
 0x3e9   :  { %v555_v32 = vpop.xlane.xlu1 %554  ;;  %v849_v35 = vpop.xlane.xlu0 %848 }
 0x3ea   :  { %2382 = vrcp.f32 %v555_v32  ;;  %v1065_v32 = vld [vmem:[#allocation10 + $0x8] sm:$0xff] }
 0x3eb   :  { %2384 = vrcp.f32 %v748_v56  ;;  %v1064_v56 = vld [vmem:[#allocation10] sm:$0xff] }
 0x3ec   :  { %2386 = vrcp.f32 %v751_v30  ;;  %v1066_v30 = vld [vmem:[#allocation10 + $0x10] sm:$0xff] }
 0x3ed   :  { %2388 = vrcp.f32 %v650_v18  ;;  %v1067_v18 = vld [vmem:[#allocation10 + $0x18] sm:$0xff] }
 0x3ee   :  { %1086 = vmatpush.msra.mxu0 %v1067_v18 }
 0x3f0   :  { %v2383_v34 = vpop.eup %2382  ;;  %1087 = vmatpush.msra.mxu0 %v1066_v30 }
 0x3f1   :  { %v559_v5 = vmul.f32 %v2383_v34, %v2964_v37  ;;  %v2385_v3 = vpop.eup %2384  ;;  %v947_v40 = vpop.xlane.xlu0 %946 }
 0x3f2   :  { %v754_v8 = vmul.f32 %v2385_v3, %v2948_v17  ;;  %v2387_v45 = vpop.eup %2386  ;;  %1088 = vmatpush.msra.mxu0 %v1065_v32 }
 0x3f3   :  { %v561_v2 = vsel %vm107_vm11, %v559_v5, 0.0  ;;  %v2389_v37 = vpop.eup %2388  ;;  %v755_v42 = vmul.f32 %v2387_v45, %v2957_v31 }
 0x3f4   :  { %2127 = vmatmul.msk.f32.gmra.mxu2 %vm243_vm9, %v561_v2  ;;  %v756_v43 = vsel %vm106_vm10, %v754_v8, 0.0  ;;  %v656_v50 = vmul.f32 %v2389_v37, %v2932_v58  ;;  %1089 = vmatpush.msra.mxu0 %v1064_v56 }
 0x3f5   :  { %v757_v53 = vsel %vm107_vm11, %v755_v42, 0.0 }
 0x3f6   :  { %v658_v31 = vsel %vm106_vm10, %v656_v50, 0.0 }
 0x3f9   :  { %v944_v9 = vpop.xlane.xlu2 %943 }
 0x3fa   :  { %2390 = vrcp.f32 %v944_v9 }
 0x3fb   :  { %2392 = vrcp.f32 %v653_v28 }
 0x3fc   :  { %2138 = vmatmul.msk.f32.vlgmr.msrb.gmra.mxu2 %vm243_vm9, %v756_v43  ;;  %2394 = vrcp.f32 %v947_v40 }
 0x400   :  { %v2391_v51 = vpop.eup %2390 }
 0x401   :  { %v2278_v46 = vpop.permute.xlu2 %2277  ;;  %v2273_v39 = vpop.permute.xlu1 %2272  ;;  %v950_v60 = vmul.f32 %v2391_v51, %v2975_v48 }
 0x402   :  { %v2279_v44 = vunpack.i.l.bf16 %v2278_v46  ;;  %v2274_v17 = vunpack.i.l.bf16 %v2273_v39  ;;  %v2280_v15 = vunpack.i.h.bf16 %v2278_v46  ;;  %v2275_v59 = vunpack.i.h.bf16 %v2273_v39  ;;  %v2393_v58 = vpop.eup %2392 }
 0x403   :  { %v657_v62 = vmul.f32 %v2393_v58, %v2944_v6  ;;  %v952_v63 = vsel %vm106_vm10, %v950_v60, 0.0  ;;  %v2395_v0 = vpop.eup %2394 }
 0x404   :  { %v2283_v52 = vpop.permute.xlu0 %2282  ;;  %980 = vmatpush.msra.mxu2 %v2279_v44  ;;  %686 = vmatpush.msra.mxu1 %v2274_v17  ;;  %v951_v48 = vmul.f32 %v2395_v0, %v2970_v41 }
 0x405   :  { %v2284_v22 = vunpack.i.l.bf16 %v2283_v52  ;;  %2139 = vmatmul.msk.f32.gmra.mxu2 %vm243_vm9, %v757_v53  ;;  %v2285_v27 = vunpack.i.h.bf16 %v2283_v52  ;;  %v659_v25 = vsel %vm107_vm11, %v657_v62, 0.0 }
 0x406   :  { %981 = vmatpush.msra.mxu2 %v2280_v15  ;;  %687 = vmatpush.msra.mxu1 %v2275_v59  ;;  %v953_v1 = vsel %vm107_vm11, %v951_v48, 0.0 }
 0x407   :  { %2132 = vmatmul.msk.f32.vlgmr.msra.gmra.mxu1 %vm243_vm9, %v658_v31 }
 0x408   :  { %882 = vmatpush.msrb.mxu1 %v2284_v22 }
 0x40a   :  { %883 = vmatpush.msrb.mxu1 %v2285_v27 }
 0x40d   :  { %2150 = vmatmul.msk.f32.vlgmr.msra.gmra.mxu2 %vm243_vm9, %v952_v63  ;;  %v2468_v63 = vld [vmem:[#allocation2] sm:$0xff] }
 0x40f   :  { %2133 = vmatmul.msk.f32.gmra.mxu1 %vm243_vm9, %v659_v25  ;;  %v297_v6 = vpop.f32.mrf.mxu2 }
 0x415   :  { %2151 = vmatmul.msk.f32.gmra.mxu2 %vm243_vm9, %v953_v1  ;;  %v2469_v1 = vld [vmem:[#allocation2 + $0x8] sm:$0xff] }
 0x417   :  { %v3056_v41 = vpop.f32.mrf.mxu2 }
 0x42c   :  { %v846_v54 = vpop.xlane.xlu1 %845 }
 0x42d   :  { %2396 = vrcp.f32 %v846_v54 }
 0x42e   :  { %2398 = vrcp.f32 %v849_v35 }
 0x431   :  { %v493_v4 = vpop.f32.mrf.mxu1 }
 0x432   :  { %999 = vrot.lane.b32.xlu2 %v493_v4, %s3450_s30 }
 0x433   :  { %v2397_v55 = vpop.eup %2396 }
 0x434   :  { %v852_v13 = vmul.f32 %v2397_v55, %v3002_v57  ;;  %v2399_v11 = vpop.eup %2398 }
 0x435   :  { %v853_v38 = vmul.f32 %v2399_v11, %v2962_v36 }
 0x436   :  { %v854_v7 = vsel %vm106_vm10, %v852_v13, 0.0 }
 0x437   :  { %2144 = vmatmul.msk.f32.vlgmr.msrb.gmra.mxu1 %vm243_vm9, %v854_v7  ;;  %v855_v14 = vsel %vm107_vm11, %v853_v38, 0.0 }
 0x439   :  { %v496_v12 = vpop.f32.mrf.mxu1 }
 0x43a   :  { %1001 = vrot.lane.b32.xlu2 %v496_v12, %s3450_s30  ;;  %s2661_s30 = smov 12  }
 0x43f   :  { %2145 = vmatmul.msk.f32.gmra.mxu1 %vm243_vm9, %v855_v14 }
 0x440   :  { %v395_v16 = vpop.f32.mrf.mxu2 }
 0x442   :  { %991 = vrot.lane.b32.xlu2 %v395_v16, %s2657_s21 }
 0x448   :  { %v398_v57 = vpop.f32.mrf.mxu2 }
 0x449   :  { %993 = vrot.lane.b32.xlu0 %v398_v57, %s2657_s21  ;;  %v1161_v57 = vld [vmem:[#allocation8 + $0x38] sm:$0xff] }
 0x44a   :  { %1180 = vmatpush.msra.mxu1 %v1161_v57 }
 0x450   :  { %v591_v61 = vpop.f32.mrf.mxu2 }
 0x477   :  { %v594_v19 = vpop.f32.mrf.mxu2 }
 0x47f   :  { %v787_v49 = vpop.f32.mrf.mxu2 }
 0x480   :  { %1023 = vrot.lane.b32.xlu2 %v787_v49, %s2658_s5  ;;  %v1158_v49 = vld [vmem:[#allocation8 + $0x20] sm:$0xff] }
 0x484   :  { %v689_v20 = vpop.f32.mrf.mxu1 }
 0x485   :  { %1015 = vrot.lane.b32.xlu1 %v689_v20, %s2630_s16 }
 0x488   :  { %v790_v36 = vpop.f32.mrf.mxu2 }
 0x48c   :  { %v692_v47 = vpop.f32.mrf.mxu1  ;;  %v1000_v28 = vpop.permute.xlu2 %999 }
 0x48d   :  { %1017 = vrot.lane.b32.xlu1 %v692_v47, %s2630_s16 }
 0x490   :  { %v983_v21 = vpop.f32.mrf.mxu2 }
 0x491   :  { %1039 = vrot.lane.b32.xlu2 %v983_v21, %s3452_s22 }
 0x494   :  { %v1002_v34 = vpop.permute.xlu2 %1001 }
 0x498   :  { %v986_v23 = vpop.f32.mrf.mxu2 }
 0x499   :  { %1025 = vrot.lane.b32.xlu2 %v790_v36, %s2658_s5  ;;  %1041 = vrot.lane.b32.xlu1 %v986_v23, %s3452_s22 }
 0x49c   :  { %v992_v5 = vpop.permute.xlu2 %991 }
 0x49d   :  { %v1045_v8 = vsel %vm211_vm8, %v297_v6, %v992_v5 }
 0x49e   :  { %v1048_v40 = vsel %vm1047_vm12, %v1045_v8, %v1000_v28 }
 0x4b4   :  { %v885_v24 = vpop.f32.mrf.mxu1 }
 0x4b5   :  { %1031 = vrot.lane.b32.xlu0 %v885_v24, %s3454_s29 }
 0x4bb   :  { %v994_v35 = vpop.permute.xlu0 %993 }
 0x4bc   :  { %v888_v26 = vpop.f32.mrf.mxu1  ;;  %v1046_v50 = vsel %vm211_vm8, %v3056_v41, %v994_v35 }
 0x4bd   :  { %1007 = vrot.lane.b32.xlu0 %v591_v61, %s2661_s30  ;;  %v1049_v52 = vsel %vm1047_vm12, %v1046_v50, %v1002_v34  ;;  %v1160_v61 = vld [vmem:[#allocation8 + $0x30] sm:$0xff]  ;;  %v2328_v34 = vld [vmem:[#allocation7 + $0x1] ss:$0 sm:$0xff] }
 0x4be   :  { %1181 = vmatpush.msra.mxu1 %v1160_v61 }
 0x4c5   :  { %1009 = vrot.lane.b32.xlu0 %v594_v19, %s2661_s30  ;;  %v1159_v19 = vld [vmem:[#allocation8 + $0x28] sm:$0xff] }
 0x4c6   :  { %1182 = vmatpush.msra.mxu1 %v1159_v19 }
 0x4c8   :  { %1183 = vmatpush.msra.mxu1 %v1158_v49 }
 0x4cd   :  { %1033 = vrot.lane.b32.xlu0 %v888_v26, %s3454_s29  ;;  %s3457_s29 = smov 24  }
 0x4da   :  { %v1024_v3 = vpop.permute.xlu2 %1023 }
 0x4eb   :  { %v1040_v46 = vpop.permute.xlu2 %1039 }
 0x4f3   :  { %v1026_v59 = vpop.permute.xlu2 %1025 }
 0x4f7   :  { %v1016_v9 = vpop.permute.xlu1 %1015 }
 0x4ff   :  { %v1018_v15 = vpop.permute.xlu1 %1017 }
 0x50b   :  { %v1042_v58 = vpop.permute.xlu1 %1041 }
 0x527   :  { %v1032_v2 = vpop.permute.xlu0 %1031 }
 0x52f   :  { %v1008_v43 = vpop.permute.xlu0 %1007 }
 0x530   :  { %v1051_v45 = vsel %vm1050_vm13, %v1048_v40, %v1008_v43 }
 0x531   :  { %v1053_v37 = vsel %vm243_vm9, %v1051_v45, %v1016_v9 }
 0x532   :  { %v1056_v42 = vsel %vm1055_vm14, %v1053_v37, %v1024_v3 }
 0x533   :  { %v1059_v44 = vsel %vm1058_vm15, %v1056_v42, %v1032_v2  ;;  %v2329_v2 = vld [vmem:[%s3445_s3 + $0x1] ss:$0 sm:$0xff]  ;;  %s3456_s3 = smov 8  }
 0x534   :  { %v1062_v39 = vsel %vm1061_vm1, %v1059_v44, %v1040_v46 }
 0x535   :  { %2152 = vmatmul.msk.f32.vlgmr.msra.gmra.mxu0 %vm108_vm0, %v1062_v39 }
 0x537   :  { %v1010_v17 = vpop.permute.xlu0 %1009 }
 0x538   :  { %v1052_v53 = vsel %vm1050_vm13, %v1049_v52, %v1010_v17 }
 0x539   :  { %v1054_v51 = vsel %vm243_vm9, %v1052_v53, %v1018_v15 }
 0x53a   :  { %v1057_v31 = vsel %vm1055_vm14, %v1054_v51, %v1026_v59 }
 0x53f   :  { %v1034_v22 = vpop.permute.xlu0 %1033 }
 0x540   :  { %v1060_v60 = vsel %vm1058_vm15, %v1057_v31, %v1034_v22 }
 0x541   :  { %v1063_v27 = vsel %vm1061_vm1, %v1060_v60, %v1042_v58 }
 0x542   :  { %2153 = vmatmul.msk.f32.gmra.mxu0 %vm108_vm0, %v1063_v27 }
 0x5b2   :  { %v1091_v62 = vpop.f32.mrf.mxu0 }
 0x5b3   :  { %v3093_v0 = vadd.f32 %v2468_v63, %v1091_v62 }
 0x5b5   :  { %v1099_v25 = vsel %vm108_vm0, %v3093_v0, 0.0 }
 0x5b6   :  { %1100 = vadd.xlane.f32.xlu2 %v1099_v25 }
 0x5bf   :  { %v1094_v48 = vpop.f32.mrf.mxu0 }
 0x5c0   :  { %v3097_v54 = vadd.f32 %v2469_v1, %v1094_v48 }
 0x5c2   :  { %v1102_v6 = vsel %vm108_vm0, %v3097_v54, 0.0 }
 0x5c3   :  { %1103 = vadd.xlane.f32.xlu0 %v1102_v6 }
 0x629   :  { %v1101_v4 = vpop.xlane.xlu2 %1100 }
 0x62a   :  { %v1105_v55 = vmul.f32 %v1101_v4, %v2729_v10 }
 0x62c   :  { %v1107_v13 = vsub.f32 %v3093_v0, %v1105_v55 }
 0x62e   :  { %v1109_v7 = vmul.f32 %v1107_v13, %v1107_v13 }
 0x630   :  { %v1111_v11 = vsel %vm108_vm0, %v1109_v7, 0.0 }
 0x631   :  { %1112 = vadd.xlane.f32.xlu1 %v1111_v11 }
 0x636   :  { %v1104_v41 = vpop.xlane.xlu0 %1103 }
 0x637   :  { %v1106_v12 = vmul.f32 %v1104_v41, %v2729_v10 }
 0x639   :  { %v1108_v38 = vsub.f32 %v3097_v54, %v1106_v12 }
 0x63b   :  { %v1110_v14 = vmul.f32 %v1108_v38, %v1108_v38 }
 0x63d   :  { %v1114_v16 = vsel %vm108_vm0, %v1110_v14, 0.0 }
 0x63e   :  { %1115 = vadd.xlane.f32.xlu2 %v1114_v16 }
 0x6a4   :  { %v1113_v20 = vpop.xlane.xlu1 %1112 }
 0x6a5   :  { %v1117_v36 = vmul.f32 %v1113_v20, %v2729_v10 }
 0x6a7   :  { %v1119_v47 = vadd.f32 1e-05, %v1117_v36 }
 0x6a9   :  { %2400 = vrsqrt.f32 %v1119_v47  ;;  %vm1127_vm3 = vweird.f32 %v1119_v47 }
 0x6af   :  { %v2401_v21 = vpop.eup %2400 }
 0x6b0   :  { %v1122_v23 = vmul.f32 %v2401_v21, %v1119_v47  ;;  %vm1128_vm2 = vweird.f32 %v2401_v21 }
 0x6b1   :  { %v1116_v24 = vpop.xlane.xlu2 %1115  ;;  %vm1129_vm4 = vmor %vm1127_vm3, %vm1128_vm2 }
 0x6b2   :  { %v1123_v26 = vmul.f32 %v2401_v21, %v1122_v23  ;;  %v1118_v18 = vmul.f32 %v1116_v24, %v2729_v10 }
 0x6b4   :  { %v1124_v28 = vmul.f32 0.5, %v1123_v26  ;;  %v1120_v30 = vadd.f32 1e-05, %v1118_v18 }
 0x6b6   :  { %v1125_v32 = vsub.f32 1.5, %v1124_v28  ;;  %2402 = vrsqrt.f32 %v1120_v30  ;;  %vm1137_vm6 = vweird.f32 %v1120_v30 }
 0x6b8   :  { %v1126_v56 = vmul.f32 %v2401_v21, %v1125_v32 }
 0x6ba   :  { %v1130_v35 = vsel %vm1129_vm4, %v2401_v21, %v1126_v56  ;;  %v2470_v56 = vld [vmem:[#allocation5] sm:$0xff] }
 0x6bb   :  { %v1141_v5 = vmul.f32 %v1130_v35, %v1107_v13 }
 0x6bc   :  { %v2403_v3 = vpop.eup %2402 }
 0x6bd   :  { %v1148_v8 = vmul.f32 %v2328_v34, %v1141_v5  ;;  %v1132_v9 = vmul.f32 %v2403_v3, %v1120_v30  ;;  %vm1138_vm5 = vweird.f32 %v2403_v3 }
 0x6be   :  { %vm1139_vm7 = vmor %vm1137_vm6, %vm1138_vm5 }
 0x6bf   :  { %v1133_v40 = vmul.f32 %v2403_v3, %v1132_v9  ;;  %v1155_v10 = vadd.f32 %v2329_v2, %v1148_v8  ;;  %v2471_v9 = vld [vmem:[#allocation5 + $0x8] sm:$0xff] }
 0x6c1   :  { %v1134_v43 = vmul.f32 0.5, %v1133_v40  ;;  %2155 = vmatmul.msk.f32.vlgmr.msra.gmra.mxu1 %vm108_vm0, %v1155_v10 }
 0x6c3   :  { %v1135_v45 = vsub.f32 1.5, %v1134_v43 }
 0x6c5   :  { %v1136_v37 = vmul.f32 %v2403_v3, %v1135_v45 }
 0x6c7   :  { %v1140_v42 = vsel %vm1139_vm7, %v2403_v3, %v1136_v37 }
 0x6c8   :  { %v1142_v46 = vmul.f32 %v1140_v42, %v1108_v38 }
 0x6ca   :  { %v1149_v44 = vmul.f32 %v2328_v34, %v1142_v46 }
 0x6cc   :  { %v1156_v39 = vadd.f32 %v2329_v2, %v1149_v44 }
 0x6ce   :  { %2156 = vmatmul.msk.f32.gmra.mxu1 %vm108_vm0, %v1156_v39 }
 0x73e   :  { %v1185_v50 = vpop.f32.mrf.mxu1 }
 0x73f   :  { %1389 = vrot.lane.b32.xlu1 %v1185_v50, %s2637_s26  ;;  %1287 = vrot.lane.b32.xlu0 %v1185_v50, %s2639_s28 }
 0x740   :  { %1193 = vrot.lane.b32.xlu2 %v1185_v50, %s2634_s23 }
 0x748   :  { %1291 = vrot.lane.b32.xlu2 %v1185_v50, %s2635_s24 }
 0x74b   :  { %v1188_v17 = vpop.f32.mrf.mxu1 }
 0x74c   :  { %1293 = vrot.lane.b32.xlu1 %v1188_v17, %s2635_s24  ;;  %1195 = vrot.lane.b32.xlu0 %v1188_v17, %s2634_s23  ;;  %v3142_v15 = vpack.i.bf16 %v1185_v50, %v1188_v17 }
 0x750   :  { %1385 = vrot.lane.b32.xlu2 %v1185_v50, %s2643_s10 }
 0x754   :  { %1487 = vrot.lane.b32.xlu1 %v1185_v50, %s2638_s27  ;;  %1585 = vrot.lane.b32.xlu0 %v1185_v50, %s2642_s9 }
 0x758   :  { %1483 = vrot.lane.b32.xlu2 %v1185_v50, %s2641_s8 }
 0x75c   :  { %1489 = vrot.lane.b32.xlu1 %v1188_v17, %s2638_s27  ;;  %1391 = vrot.lane.b32.xlu0 %v1188_v17, %s2637_s26  ;;  %s2087_s26 = sshll.u32 %s3448_s6, 4  ;;  %s3459_s27 = smov 128   ;;  %s2088_s26 = int_to_ptr.hbm [resolvable:$true] %s2087_s26 }
 0x760   :  { %1387 = vrot.lane.b32.xlu2 %v1188_v17, %s2643_s10 }
 0x764   :  { %1581 = vrot.lane.b32.xlu1 %v1185_v50, %s2644_s1  ;;  %1289 = vrot.lane.b32.xlu0 %v1188_v17, %s2639_s28 }
 0x768   :  { %1485 = vrot.lane.b32.xlu2 %v1188_v17, %s2641_s8 }
 0x76c   :  { %1583 = vrot.lane.b32.xlu1 %v1188_v17, %s2644_s1  ;;  %1587 = vrot.lane.b32.xlu0 %v1188_v17, %s2642_s9 }
 0x770   :  { %1783 = vrot.lane.b32.xlu2 %v1188_v17, %s2648_s13 }
 0x774   :  { %1679 = vrot.lane.b32.xlu1 %v1185_v50, %s2636_s25  ;;  %1685 = vrot.lane.b32.xlu0 %v1188_v17, %s2640_s7 }
 0x778   :  { %1781 = vrot.lane.b32.xlu2 %v1185_v50, %s2648_s13 }
 0x77c   :  { %1681 = vrot.lane.b32.xlu1 %v1188_v17, %s2636_s25  ;;  %1683 = vrot.lane.b32.xlu0 %v1185_v50, %s2640_s7 }
 0x780   :  { %1881 = vrot.lane.b32.xlu2 %v1188_v17, %s2646_s11 }
 0x784   :  { %1879 = vrot.lane.b32.xlu1 %v1185_v50, %s2646_s11  ;;  %1777 = vrot.lane.b32.xlu0 %v1185_v50, %s2649_s14 }
 0x788   :  { %1875 = vrot.lane.b32.xlu2 %v1185_v50, %s2645_s4 }
 0x78c   :  { %2287 = vrot.lane.b32.xlu1 %v3142_v15, %s2650_s15  ;;  %1779 = vrot.lane.b32.xlu0 %v1188_v17, %s2649_s14 }
 0x790   :  { %2292 = vrot.lane.b32.xlu2 %v3142_v15, %s2647_s12 }
 0x794   :  { %1877 = vrot.lane.b32.xlu0 %v1188_v17, %s2645_s4 }
 0x79a   :  { %v1194_v52 = vpop.permute.xlu2 %1193 }
 0x79c   :  { %2297 = vrot.lane.b32.xlu0 %v3142_v15, %s2653_s18 }
 0x7a2   :  { %v1292_v53 = vpop.permute.xlu2 %1291 }
 0x7aa   :  { %v1386_v51 = vpop.permute.xlu2 %1385 }
 0x7b1   :  { %v1390_v22 = vpop.permute.xlu1 %1389  ;;  %v1288_v31 = vpop.permute.xlu0 %1287 }
 0x7b2   :  { %v1484_v59 = vpop.permute.xlu2 %1483 }
 0x7ba   :  { %v1388_v58 = vpop.permute.xlu2 %1387 }
 0x7be   :  { %v1294_v60 = vpop.permute.xlu1 %1293  ;;  %v1196_v27 = vpop.permute.xlu0 %1195 }
 0x7bf   :  { %2157 = vmatpush.xpose.msk.msra.mxu3 %vm211_vm8, %v1196_v27  ;;  %2163 = vmatpush.xpose.msk.msrb.mxu0 %vm211_vm8, %v1294_v60 }
 0x7c2   :  { %v1486_v62 = vpop.permute.xlu2 %1485 }
 0x7c3   :  { %2158 = vmatpush.xpose.msk.msra.mxu3 %vm211_vm8, %v1194_v52  ;;  %2164 = vmatpush.xpose.msk.msrb.mxu0 %vm211_vm8, %v1292_v53 }
 0x7c6   :  { %2165 = vmatmul.msk.f32.vlgmr.msrb.gmra.mxu0 %vm211_vm8, %v1288_v31  ;;  %v1488_v63 = vpop.permute.xlu1 %1487  ;;  %2159 = vmatmul.msk.f32.vlgmr.msra.gmra.mxu3 %vm211_vm8, %v1185_v50  ;;  %v1586_v25 = vpop.permute.xlu0 %1585 }
 0x7ca   :  { %v1784_v48 = vpop.permute.xlu2 %1783 }
 0x7ce   :  { %v1490_v1 = vpop.permute.xlu1 %1489  ;;  %2160 = vmatmul.msk.f32.gmra.mxu3 %vm211_vm8, %v1188_v17  ;;  %v1392_v6 = vpop.permute.xlu0 %1391 }
 0x7cf   :  { %2169 = vmatpush.xpose.msk.msrb.mxu3 %vm211_vm8, %v1392_v6  ;;  %2175 = vmatpush.xpose.msk.msra.mxu0 %vm211_vm8, %v1490_v1 }
 0x7d2   :  { %v1782_v4 = vpop.permute.xlu2 %1781 }
 0x7d3   :  { %2170 = vmatpush.xpose.msk.msrb.mxu3 %vm211_vm8, %v1390_v22  ;;  %2176 = vmatpush.xpose.msk.msra.mxu0 %vm211_vm8, %v1488_v63 }
 0x7d6   :  { %v1582_v55 = vpop.permute.xlu1 %1581  ;;  %2171 = vmatmul.msk.f32.vlgmr.msrb.gmra.mxu3 %vm211_vm8, %v1386_v51  ;;  %v1290_v13 = vpop.permute.xlu0 %1289 }
 0x7d7   :  { %2166 = vmatmul.msk.f32.gmra.mxu0 %vm211_vm8, %v1290_v13 }
 0x7da   :  { %v1882_v7 = vpop.permute.xlu2 %1881 }
 0x7de   :  { %v1584_v11 = vpop.permute.xlu1 %1583  ;;  %2172 = vmatmul.msk.f32.gmra.mxu3 %vm211_vm8, %v1388_v58  ;;  %v1588_v41 = vpop.permute.xlu0 %1587 }
 0x7df   :  { %2177 = vmatmul.msk.f32.vlgmr.msra.gmra.mxu0 %vm211_vm8, %v1484_v59  ;;  %2181 = vmatpush.xpose.msk.msra.mxu3 %vm211_vm8, %v1588_v41 }
 0x7e2   :  { %v1876_v12 = vpop.permute.xlu2 %1875 }
 0x7e3   :  { %2182 = vmatpush.xpose.msk.msra.mxu3 %vm211_vm8, %v1586_v25 }
 0x7e6   :  { %v1680_v38 = vpop.permute.xlu1 %1679  ;;  %2183 = vmatmul.msk.f32.vlgmr.msra.gmra.mxu3 %vm211_vm8, %v1582_v55  ;;  %v1686_v14 = vpop.permute.xlu0 %1685 }
 0x7e7   :  { %2193 = vmatpush.xpose.msk.msrb.mxu3 %vm211_vm8, %v1784_v48  ;;  %2178 = vmatmul.msk.f32.gmra.mxu0 %vm211_vm8, %v1486_v62 }
 0x7e8   :  { %2187 = vmatpush.xpose.msk.msrb.mxu0 %vm211_vm8, %v1686_v14 }
 0x7ea   :  { %v2293_v16 = vpop.permute.xlu2 %2292 }
 0x7eb   :  { %2194 = vmatpush.xpose.msk.msrb.mxu3 %vm211_vm8, %v1782_v4  ;;  %v2294_v57 = vunpack.i.l.bf16 %v2293_v16  ;;  %v2295_v61 = vunpack.i.h.bf16 %v2293_v16 }
 0x7ed   :  { %1376 = vmatpush.msrb.mxu1 %v2294_v57 }
 0x7ee   :  { %v1682_v19 = vpop.permute.xlu1 %1681  ;;  %2184 = vmatmul.msk.f32.gmra.mxu3 %vm211_vm8, %v1584_v11  ;;  %v1684_v49 = vpop.permute.xlu0 %1683 }
 0x7ef   :  { %1377 = vmatpush.msrb.mxu1 %v2295_v61  ;;  %2188 = vmatpush.xpose.msk.msrb.mxu0 %vm211_vm8, %v1684_v49 }
 0x7f2   :  { %2189 = vmatmul.msk.f32.vlgmr.msrb.gmra.mxu0 %vm211_vm8, %v1680_v38 }
 0x7f3   :  { %2199 = vmatpush.xpose.msk.msra.mxu0 %vm211_vm8, %v1882_v7 }
 0x7f6   :  { %v1880_v20 = vpop.permute.xlu1 %1879  ;;  %v1778_v36 = vpop.permute.xlu0 %1777 }
 0x7f7   :  { %2195 = vmatmul.msk.f32.vlgmr.msrb.gmra.mxu3 %vm211_vm8, %v1778_v36  ;;  %2200 = vmatpush.xpose.msk.msra.mxu0 %vm211_vm8, %v1880_v20 }
 0x7fa   :  { %2190 = vmatmul.msk.f32.gmra.mxu0 %vm211_vm8, %v1682_v19 }
 0x7fe   :  { %v2288_v47 = vpop.permute.xlu1 %2287  ;;  %v1780_v21 = vpop.permute.xlu0 %1779 }
 0x7ff   :  { %v2289_v23 = vunpack.i.l.bf16 %v2288_v47  ;;  %2196 = vmatmul.msk.f32.gmra.mxu3 %vm211_vm8, %v1780_v21  ;;  %v2290_v24 = vunpack.i.h.bf16 %v2288_v47 }
 0x801   :  { %1278 = vmatpush.msrb.mxu2 %v2289_v23 }
 0x802   :  { %2201 = vmatmul.msk.f32.vlgmr.msra.gmra.mxu0 %vm211_vm8, %v1876_v12 }
 0x803   :  { %1279 = vmatpush.msrb.mxu2 %v2290_v24 }
 0x806   :  { %v1878_v26 = vpop.permute.xlu0 %1877 }
 0x80a   :  { %2202 = vmatmul.msk.f32.gmra.mxu0 %vm211_vm8, %v1878_v26 }
 0x80e   :  { %v2298_v18 = vpop.permute.xlu0 %2297 }
 0x80f   :  { %v2299_v28 = vunpack.i.l.bf16 %v2298_v18  ;;  %v2300_v30 = vunpack.i.h.bf16 %v2298_v18 }
 0x811   :  { %1474 = vmatpush.msra.mxu2 %v2299_v28 }
 0x813   :  { %1475 = vmatpush.msra.mxu2 %v2300_v30 }
 0x843   :  { %v1320_v32 = vpop.f32.mrf.mxu0 }
 0x844   :  { %v3184_v34 = vadd.f32 %v2470_v56, %v1320_v32 }
 0x846   :  { %v1326_v35 = vsel %vm243_vm9, %v3184_v34, -inf }
 0x847   :  { %1327 = vmax.xlane.f32.xlu2 %v1326_v35 }
 0x849   :  { %v1222_v5 = vpop.f32.mrf.mxu3 }
 0x84a   :  { %v3188_v2 = vadd.f32 %v2470_v56, %v1222_v5 }
 0x84c   :  { %v1228_v3 = vsel %vm243_vm9, %v3188_v2, -inf }
 0x84d   :  { %1229 = vmax.xlane.f32.xlu1 %v1228_v3 }
 0x851   :  { %v1225_v8 = vpop.f32.mrf.mxu3 }
 0x852   :  { %v3192_v40 = vadd.f32 %v2471_v9, %v1225_v8 }
 0x854   :  { %v1323_v10 = vpop.f32.mrf.mxu0  ;;  %v1231_v43 = vsel %vm243_vm9, %v3192_v40, -inf }
 0x855   :  { %v3196_v45 = vadd.f32 %v2471_v9, %v1323_v10  ;;  %1232 = vmax.xlane.f32.xlu0 %v1231_v43 }
 0x857   :  { %v1329_v37 = vsel %vm243_vm9, %v3196_v45, -inf }
 0x858   :  { %1330 = vmax.xlane.f32.xlu1 %v1329_v37 }
 0x859   :  { %v1418_v42 = vpop.f32.mrf.mxu3 }
 0x85a   :  { %v3200_v46 = vadd.f32 %v2470_v56, %v1418_v42 }
 0x85c   :  { %v1516_v44 = vpop.f32.mrf.mxu0  ;;  %v1424_v39 = vsel %vm243_vm9, %v3200_v46, -inf }
 0x85d   :  { %v3204_v50 = vadd.f32 %v2470_v56, %v1516_v44  ;;  %1425 = vmax.xlane.f32.xlu2 %v1424_v39 }
 0x85f   :  { %v1522_v17 = vsel %vm243_vm9, %v3204_v50, -inf }
 0x860   :  { %1523 = vmax.xlane.f32.xlu0 %v1522_v17 }
 0x861   :  { %v1421_v52 = vpop.f32.mrf.mxu3 }
 0x862   :  { %v3208_v53 = vadd.f32 %v2471_v9, %v1421_v52 }
 0x864   :  { %v1519_v51 = vpop.f32.mrf.mxu0  ;;  %v1427_v59 = vsel %vm243_vm9, %v3208_v53, -inf }
 0x865   :  { %v3212_v22 = vadd.f32 %v2471_v9, %v1519_v51  ;;  %1428 = vmax.xlane.f32.xlu1 %v1427_v59 }
 0x867   :  { %v1525_v31 = vsel %vm243_vm9, %v3212_v22, -inf }
 0x868   :  { %1526 = vmax.xlane.f32.xlu2 %v1525_v31 }
 0x869   :  { %v1614_v58 = vpop.f32.mrf.mxu3 }
 0x86a   :  { %v3216_v60 = vadd.f32 %v2470_v56, %v1614_v58 }
 0x86c   :  { %v1620_v27 = vsel %vm243_vm9, %v3216_v60, -inf }
 0x86d   :  { %1621 = vmax.xlane.f32.xlu0 %v1620_v27 }
 0x86f   :  { %v1712_v62 = vpop.f32.mrf.mxu0 }
 0x870   :  { %v3220_v63 = vadd.f32 %v2470_v56, %v1712_v62 }
 0x871   :  { %v1617_v25 = vpop.f32.mrf.mxu3 }
 0x872   :  { %v3222_v48 = vadd.f32 %v2471_v9, %v1617_v25  ;;  %v1718_v1 = vsel %vm243_vm9, %v3220_v63, -inf }
 0x873   :  { %1719 = vmax.xlane.f32.xlu1 %v1718_v1 }
 0x874   :  { %v1623_v6 = vsel %vm243_vm9, %v3222_v48, -inf }
 0x875   :  { %1624 = vmax.xlane.f32.xlu2 %v1623_v6 }
 0x877   :  { %v1715_v4 = vpop.f32.mrf.mxu0 }
 0x878   :  { %v3228_v55 = vadd.f32 %v2471_v9, %v1715_v4 }
 0x87a   :  { %v1810_v13 = vpop.f32.mrf.mxu3  ;;  %v1721_v7 = vsel %vm243_vm9, %v3228_v55, -inf }
 0x87b   :  { %v3232_v11 = vadd.f32 %v2470_v56, %v1810_v13  ;;  %1722 = vmax.xlane.f32.xlu0 %v1721_v7 }
 0x87d   :  { %v1816_v41 = vsel %vm243_vm9, %v3232_v11, -inf }
 0x87e   :  { %1817 = vmax.xlane.f32.xlu1 %v1816_v41 }
 0x87f   :  { %v1908_v12 = vpop.f32.mrf.mxu0 }
 0x880   :  { %v3236_v38 = vadd.f32 %v2470_v56, %v1908_v12 }
 0x882   :  { %v1813_v14 = vpop.f32.mrf.mxu3  ;;  %v1914_v16 = vsel %vm243_vm9, %v3236_v38, -inf }
 0x883   :  { %v3240_v57 = vadd.f32 %v2471_v9, %v1813_v14  ;;  %1915 = vmax.xlane.f32.xlu0 %v1914_v16 }
 0x885   :  { %v1819_v61 = vsel %vm243_vm9, %v3240_v57, -inf }
 0x886   :  { %1820 = vmax.xlane.f32.xlu1 %v1819_v61 }
 0x887   :  { %v1911_v19 = vpop.f32.mrf.mxu0 }
 0x888   :  { %v3244_v49 = vadd.f32 %v2471_v9, %v1911_v19 }
 0x88a   :  { %v1917_v20 = vsel %vm243_vm9, %v3244_v49, -inf }
 0x88b   :  { %1918 = vmax.xlane.f32.xlu2 %v1917_v20 }
 0x8ba   :  { %v1328_v36 = vpop.xlane.xlu2 %1327 }
 0x8bb   :  { %v1332_v47 = vsub.f32 %v3184_v34, %v1328_v36 }
 0x8bd   :  { %v1334_v21 = vmul.f32 1.442695, %v1332_v47 }
 0x8bf   :  { %2404 = vpow2.f32 %v1334_v21 }
 0x8c0   :  { %v1230_v23 = vpop.xlane.xlu1 %1229 }
 0x8c1   :  { %v1234_v24 = vsub.f32 %v3188_v2, %v1230_v23 }
 0x8c3   :  { %v1236_v26 = vmul.f32 1.442695, %v1234_v24 }
 0x8c5   :  { %v3250_v18 = vpop.eup %2404  ;;  %2406 = vpow2.f32 %v1236_v26 }
 0x8c6   :  { %v1338_v28 = vsel %vm243_vm9, %v3250_v18, 0.0 }
 0x8c7   :  { %1339 = vadd.xlane.f32.xlu2 %v1338_v28 }
 0x8c8   :  { %v1233_v32 = vpop.xlane.xlu0 %1232 }
 0x8c9   :  { %v1235_v34 = vsub.f32 %v3192_v40, %v1233_v32 }
 0x8cb   :  { %v3254_v30 = vpop.eup %2406  ;;  %v1331_v56 = vpop.xlane.xlu1 %1330  ;;  %v1238_v3 = vmul.f32 1.442695, %v1235_v34 }
 0x8cc   :  { %v1333_v35 = vsub.f32 %v3196_v45, %v1331_v56  ;;  %v1240_v2 = vsel %vm243_vm9, %v3254_v30, 0.0 }
 0x8ce   :  { %v1336_v5 = vmul.f32 1.442695, %v1333_v35 }
 0x8cf   :  { %1241 = vadd.xlane.f32.xlu2 %v1240_v2 }
 0x8d0   :  { %2408 = vpow2.f32 %v1336_v5  ;;  %v1426_v8 = vpop.xlane.xlu2 %1425 }
 0x8d1   :  { %2410 = vpow2.f32 %v1238_v3  ;;  %v1430_v51 = vsub.f32 %v3200_v46, %v1426_v8 }
 0x8d3   :  { %v1524_v9 = vpop.xlane.xlu0 %1523  ;;  %v1432_v31 = vmul.f32 1.442695, %v1430_v51 }
 0x8d4   :  { %v1528_v43 = vsub.f32 %v3204_v50, %v1524_v9 }
 0x8d6   :  { %v3260_v10 = vpop.eup %2408  ;;  %v1530_v42 = vmul.f32 1.442695, %v1528_v43 }
 0x8d7   :  { %v1341_v37 = vsel %vm243_vm9, %v3260_v10, 0.0  ;;  %v3266_v17 = vpop.eup %2410 }
 0x8d8   :  { %v1429_v45 = vpop.xlane.xlu1 %1428  ;;  %1342 = vadd.xlane.f32.xlu0 %v1341_v37  ;;  %v1243_v50 = vsel %vm243_vm9, %v3266_v17, 0.0 }
 0x8d9   :  { %v1431_v40 = vsub.f32 %v3208_v53, %v1429_v45 }
 0x8db   :  { %v1434_v44 = vmul.f32 1.442695, %v1431_v40  ;;  %v1527_v39 = vpop.xlane.xlu2 %1526 }
 0x8dc   :  { %v1529_v52 = vsub.f32 %v3212_v22, %v1527_v39 }
 0x8dd   :  { %2412 = vpow2.f32 %v1434_v44 }
 0x8de   :  { %2414 = vpow2.f32 %v1530_v42  ;;  %v1532_v59 = vmul.f32 1.442695, %v1529_v52 }
 0x8e0   :  { %2416 = vpow2.f32 %v1532_v59  ;;  %1244 = vadd.xlane.f32.xlu0 %v1243_v50  ;;  %v1622_v41 = vpop.xlane.xlu0 %1621 }
 0x8e1   :  { %2418 = vpow2.f32 %v1432_v31  ;;  %v1626_v19 = vsub.f32 %v3216_v60, %v1622_v41 }
 0x8e3   :  { %v3272_v58 = vpop.eup %2412  ;;  %v1628_v36 = vmul.f32 1.442695, %v1626_v19 }
 0x8e4   :  { %v3274_v53 = vpop.eup %2414  ;;  %v1439_v27 = vsel %vm243_vm9, %v3272_v58, 0.0 }
 0x8e5   :  { %1440 = vadd.xlane.f32.xlu1 %v1439_v27  ;;  %v1534_v1 = vsel %vm243_vm9, %v3274_v53, 0.0 }
 0x8e6   :  { %v3278_v22 = vpop.eup %2416  ;;  %v1720_v46 = vpop.xlane.xlu1 %1719 }
 0x8e7   :  { %v1724_v62 = vsub.f32 %v3220_v63, %v1720_v46  ;;  %v1537_v25 = vsel %vm243_vm9, %v3278_v22, 0.0  ;;  %v3285_v4 = vpop.eup %2418 }
 0x8e8   :  { %1538 = vadd.xlane.f32.xlu2 %v1537_v25  ;;  %1535 = vadd.xlane.f32.xlu0 %v1534_v1  ;;  %v1436_v13 = vsel %vm243_vm9, %v3285_v4, 0.0  ;;  %v1625_v26 = vpop.xlane.xlu2 %1624 }
 0x8e9   :  { %v1726_v6 = vmul.f32 1.442695, %v1724_v62  ;;  %v1627_v60 = vsub.f32 %v3222_v48, %v1625_v26 }
 0x8eb   :  { %2420 = vpow2.f32 %v1726_v6  ;;  %v1630_v35 = vmul.f32 1.442695, %v1627_v60 }
 0x8ee   :  { %v1723_v12 = vpop.xlane.xlu0 %1722 }
 0x8ef   :  { %v1725_v47 = vsub.f32 %v3228_v55, %v1723_v12 }
 0x8f0   :  { %1437 = vadd.xlane.f32.xlu0 %v1436_v13 }
 0x8f1   :  { %v3289_v7 = vpop.eup %2420  ;;  %v1818_v20 = vpop.xlane.xlu1 %1817  ;;  %v1728_v24 = vmul.f32 1.442695, %v1725_v47 }
 0x8f2   :  { %v1730_v63 = vsel %vm243_vm9, %v3289_v7, 0.0  ;;  %v1822_v21 = vsub.f32 %v3232_v11, %v1818_v20 }
 0x8f3   :  { %1731 = vadd.xlane.f32.xlu1 %v1730_v63 }
 0x8f4   :  { %v1824_v28 = vmul.f32 1.442695, %v1822_v21 }
 0x8f6   :  { %v1916_v14 = vpop.xlane.xlu0 %1915 }
 0x8f7   :  { %v1920_v16 = vsub.f32 %v3236_v38, %v1916_v14 }
 0x8f9   :  { %v1922_v61 = vmul.f32 1.442695, %v1920_v16  ;;  %v1821_v38 = vpop.xlane.xlu1 %1820 }
 0x8fa   :  { %v1823_v55 = vsub.f32 %v3240_v57, %v1821_v38 }
 0x8fb   :  { %2422 = vpow2.f32 %v1922_v61 }
 0x8fc   :  { %2424 = vpow2.f32 %v1628_v36  ;;  %v1826_v34 = vmul.f32 1.442695, %v1823_v55 }
 0x8fd   :  { %2426 = vpow2.f32 %v1728_v24 }
 0x8fe   :  { %2428 = vpow2.f32 %v1824_v28  ;;  %v1919_v2 = vpop.xlane.xlu2 %1918 }
 0x8ff   :  { %2430 = vpow2.f32 %v1630_v35  ;;  %v1921_v8 = vsub.f32 %v3244_v49, %v1919_v2 }
 0x900   :  { %2307 = vrot.lane.b32.xlu2 %v3142_v15, %s2654_s19  ;;  %2432 = vpow2.f32 %v1826_v34 }
 0x901   :  { %v3303_v23 = vpop.eup %2422  ;;  %v1924_v9 = vmul.f32 1.442695, %v1921_v8 }
 0x902   :  { %v1926_v32 = vsel %vm243_vm9, %v3303_v23, 0.0  ;;  %v3307_v56 = vpop.eup %2424 }
 0x903   :  { %v1632_v11 = vsel %vm243_vm9, %v3307_v56, 0.0  ;;  %v3313_v5 = vpop.eup %2426 }
 0x904   :  { %2302 = vrot.lane.b32.xlu0 %v3142_v15, %s2651_s0  ;;  %v3315_v3 = vpop.eup %2428  ;;  %v1733_v57 = vsel %vm243_vm9, %v3313_v5, 0.0 }
 0x905   :  { %v1828_v48 = vsel %vm243_vm9, %v3315_v3, 0.0  ;;  %v3322_v43 = vpop.eup %2430 }
 0x906   :  { %v3324_v37 = vpop.eup %2432  ;;  %v1635_v49 = vsel %vm243_vm9, %v3322_v43, 0.0 }
 0x907   :  { %v1831_v40 = vsel %vm243_vm9, %v3324_v37, 0.0 }
 0x90c   :  { %2312 = vrot.lane.b32.xlu1 %v3142_v15, %s2652_s17 }
 0x929   :  { %1927 = vadd.xlane.f32.xlu2 %v1926_v32 }
 0x92e   :  { %1633 = vadd.xlane.f32.xlu0 %v1632_v11 }
 0x936   :  { %1829 = vadd.xlane.f32.xlu0 %v1828_v48  ;;  %1734 = vadd.xlane.f32.xlu1 %v1733_v57 }
 0x93a   :  { %v1340_v45 = vpop.xlane.xlu2 %1339 }
 0x93b   :  { %2434 = vrcp.f32 %v1340_v45 }
 0x93c   :  { %2436 = vpow2.f32 %v1924_v9 }
 0x93e   :  { %1832 = vadd.xlane.f32.xlu0 %v1831_v40  ;;  %1636 = vadd.xlane.f32.xlu1 %v1635_v49 }
 0x941   :  { %v2435_v42 = vpop.eup %2434 }
 0x942   :  { %v3330_v44 = vpop.eup %2436  ;;  %v1346_v39 = vmul.f32 %v2435_v42, %v3250_v18  ;;  %v1242_v52 = vpop.xlane.xlu2 %1241 }
 0x943   :  { %2438 = vrcp.f32 %v1242_v52  ;;  %v1929_v59 = vsel %vm243_vm9, %v3330_v44, 0.0 }
 0x944   :  { %v1348_v51 = vsel %vm106_vm10, %v1346_v39, 0.0 }
 0x945   :  { %2167 = vmatmul.msk.f32.vlgmr.msrb.gmra.mxu1 %vm243_vm9, %v1348_v51 }
 0x946   :  { %1930 = vadd.xlane.f32.xlu0 %v1929_v59 }
 0x949   :  { %v2439_v50 = vpop.eup %2438 }
 0x94a   :  { %v1248_v31 = vmul.f32 %v2439_v50, %v3254_v30 }
 0x94b   :  { %v1343_v27 = vpop.xlane.xlu0 %1342 }
 0x94c   :  { %2440 = vrcp.f32 %v1343_v27  ;;  %v1250_v46 = vsel %vm106_vm10, %v1248_v31, 0.0 }
 0x94d   :  { %2161 = vmatmul.msk.f32.vlgmr.msrb.gmra.mxu2 %vm243_vm9, %v1250_v46 }
 0x952   :  { %v2441_v18 = vpop.eup %2440 }
 0x953   :  { %v1245_v62 = vpop.xlane.xlu0 %1244  ;;  %v1347_v25 = vmul.f32 %v2441_v18, %v3260_v10 }
 0x954   :  { %2442 = vrcp.f32 %v1245_v62 }
 0x955   :  { %v1349_v1 = vsel %vm107_vm11, %v1347_v25, 0.0 }
 0x956   :  { %2168 = vmatmul.msk.f32.gmra.mxu1 %vm243_vm9, %v1349_v1 }
 0x957   :  { %2317 = vrot.lane.b32.xlu1 %v3142_v15, %s2655_s2 }
 0x958   :  { %v1441_v16 = vpop.xlane.xlu1 %1440 }
 0x95a   :  { %v2443_v30 = vpop.eup %2442 }
 0x95b   :  { %v1539_v6 = vpop.xlane.xlu2 %1538  ;;  %v1536_v13 = vpop.xlane.xlu0 %1535  ;;  %v1249_v63 = vmul.f32 %v2443_v30, %v3266_v17 }
 0x95d   :  { %v1251_v41 = vsel %vm107_vm11, %v1249_v63, 0.0 }
 0x95e   :  { %2162 = vmatmul.msk.f32.gmra.mxu2 %vm243_vm9, %v1251_v41 }
 0x95f   :  { %2322 = vrot.lane.b32.xlu1 %v3142_v15, %s2656_s20 }
 0x963   :  { %v2308_v10 = vpop.permute.xlu2 %2307  ;;  %v1438_v12 = vpop.xlane.xlu0 %1437 }
 0x964   :  { %v2309_v14 = vunpack.i.l.bf16 %v2308_v10  ;;  %2444 = vrcp.f32 %v1438_v12  ;;  %v2310_v61 = vunpack.i.h.bf16 %v2308_v10 }
 0x965   :  { %2446 = vrcp.f32 %v1441_v16 }
 0x966   :  { %1670 = vmatpush.msrb.mxu2 %v2309_v14  ;;  %2448 = vrcp.f32 %v1536_v13  ;;  %v1732_v24 = vpop.xlane.xlu1 %1731 }
 0x967   :  { %2450 = vrcp.f32 %v1539_v6 }
 0x968   :  { %1671 = vmatpush.msrb.mxu2 %v2310_v61  ;;  %2452 = vrcp.f32 %v1732_v24 }
 0x96a   :  { %v2445_v19 = vpop.eup %2444 }
 0x96b   :  { %v1444_v17 = vmul.f32 %v2445_v19, %v3285_v4  ;;  %v2447_v36 = vpop.eup %2446 }
 0x96c   :  { %v1445_v15 = vmul.f32 %v2447_v36, %v3272_v58  ;;  %v2449_v47 = vpop.eup %2448 }
 0x96d   :  { %v1446_v20 = vsel %vm106_vm10, %v1444_v17, 0.0  ;;  %v1542_v4 = vmul.f32 %v2449_v47, %v3274_v53  ;;  %v2451_v60 = vpop.eup %2450 }
 0x96e   :  { %2173 = vmatmul.msk.f32.vlgmr.msra.gmra.mxu2 %vm243_vm9, %v1446_v20  ;;  %v1447_v21 = vsel %vm107_vm11, %v1445_v15, 0.0  ;;  %v1543_v11 = vmul.f32 %v2451_v60, %v3278_v22  ;;  %v2453_v34 = vpop.eup %2452  ;;  %v2045_v60 = vld [vmem:[#allocation10 + $0x28] sm:$0xff] }
 0x96f   :  { %v1544_v38 = vsel %vm106_vm10, %v1542_v4, 0.0  ;;  %v1738_v2 = vmul.f32 %v2453_v34, %v3289_v7 }
 0x970   :  { %v1545_v53 = vsel %vm107_vm11, %v1543_v11, 0.0 }
 0x971   :  { %v1740_v8 = vsel %vm106_vm10, %v1738_v2, 0.0 }
 0x976   :  { %v2303_v26 = vpop.permute.xlu0 %2302  ;;  %2174 = vmatmul.msk.f32.gmra.mxu2 %vm243_vm9, %v1447_v21 }
 0x977   :  { %v2304_v28 = vunpack.i.l.bf16 %v2303_v26  ;;  %v2305_v32 = vunpack.i.h.bf16 %v2303_v26 }
 0x979   :  { %1572 = vmatpush.msra.mxu1 %v2304_v28  ;;  %v2047_v28 = vld [vmem:[#allocation10 + $0x38] sm:$0xff] }
 0x97a   :  { %2066 = vmatpush.msra.mxu3 %v2047_v28 }
 0x97b   :  { %1573 = vmatpush.msra.mxu1 %v2305_v32  ;;  %v2046_v32 = vld [vmem:[#allocation10 + $0x30] sm:$0xff] }
 0x97c   :  { %2179 = vmatmul.msk.f32.vlgmr.msra.gmra.mxu1 %vm243_vm9, %v1544_v38  ;;  %2067 = vmatpush.msra.mxu3 %v2046_v32 }
 0x97e   :  { %v2313_v58 = vpop.permute.xlu1 %2312  ;;  %2068 = vmatpush.msra.mxu3 %v2045_v60 }
 0x97f   :  { %v2314_v55 = vunpack.i.l.bf16 %v2313_v58  ;;  %v2315_v35 = vunpack.i.h.bf16 %v2313_v58 }
 0x981   :  { %1768 = vmatpush.msrb.mxu1 %v2314_v55  ;;  %v2044_v55 = vld [vmem:[#allocation10 + $0x20] sm:$0xff] }
 0x982   :  { %2069 = vmatpush.msra.mxu3 %v2044_v55 }
 0x983   :  { %1769 = vmatpush.msrb.mxu1 %v2315_v35 }
 0x984   :  { %2180 = vmatmul.msk.f32.gmra.mxu1 %vm243_vm9, %v1545_v53 }
 0x98c   :  { %2191 = vmatmul.msk.f32.vlgmr.msrb.gmra.mxu1 %vm243_vm9, %v1740_v8 }
 0x99c   :  { %v1928_v50 = vpop.xlane.xlu2 %1927 }
 0x9a1   :  { %v1634_v48 = vpop.xlane.xlu0 %1633 }
 0x9a2   :  { %2454 = vrcp.f32 %v1634_v48 }
 0x9a8   :  { %v2455_v57 = vpop.eup %2454 }
 0x9a9   :  { %v1640_v22 = vmul.f32 %v2455_v57, %v3307_v56  ;;  %v1735_v9 = vpop.xlane.xlu1 %1734  ;;  %v1830_v52 = vpop.xlane.xlu0 %1829 }
 0x9aa   :  { %2456 = vrcp.f32 %v1735_v9 }
 0x9ab   :  { %v1642_v45 = vsel %vm106_vm10, %v1640_v22, 0.0 }
 0x9ac   :  { %2185 = vmatmul.msk.f32.vlgmr.msrb.gmra.mxu2 %vm243_vm9, %v1642_v45 }
 0x9b0   :  { %v2457_v40 = vpop.eup %2456 }
 0x9b1   :  { %v1637_v49 = vpop.xlane.xlu1 %1636  ;;  %v1739_v7 = vmul.f32 %v2457_v40, %v3313_v5  ;;  %v1833_v5 = vpop.xlane.xlu0 %1832 }
 0x9b2   :  { %2458 = vrcp.f32 %v1637_v49 }
 0x9b3   :  { %v1741_v42 = vsel %vm107_vm11, %v1739_v7, 0.0  ;;  %2460 = vrcp.f32 %v1830_v52 }
 0x9b4   :  { %2192 = vmatmul.msk.f32.gmra.mxu1 %vm243_vm9, %v1741_v42  ;;  %2462 = vrcp.f32 %v1928_v50 }
 0x9b5   :  { %2464 = vrcp.f32 %v1833_v5 }
 0x9b8   :  { %v2459_v39 = vpop.eup %2458 }
 0x9b9   :  { %v1641_v56 = vmul.f32 %v2459_v39, %v3322_v43  ;;  %v2461_v31 = vpop.eup %2460  ;;  %v1931_v25 = vpop.xlane.xlu0 %1930 }
 0x9ba   :  { %v1836_v46 = vmul.f32 %v2461_v31, %v3315_v3  ;;  %v2463_v62 = vpop.eup %2462  ;;  %2466 = vrcp.f32 %v1931_v25 }
 0x9bb   :  { %v1643_v51 = vsel %vm107_vm11, %v1641_v56, 0.0  ;;  %v2465_v30 = vpop.eup %2464  ;;  %v1934_v13 = vmul.f32 %v2463_v62, %v3303_v23 }
 0x9bc   :  { %2186 = vmatmul.msk.f32.gmra.mxu2 %vm243_vm9, %v1643_v51  ;;  %v1838_v1 = vsel %vm106_vm10, %v1836_v46, 0.0  ;;  %v1837_v41 = vmul.f32 %v2465_v30, %v3324_v37 }
 0x9bd   :  { %v1936_v14 = vsel %vm106_vm10, %v1934_v13, 0.0 }
 0x9be   :  { %v1839_v12 = vsel %vm107_vm11, %v1837_v41, 0.0 }
 0x9c0   :  { %v2467_v16 = vpop.eup %2466 }
 0x9c1   :  { %v1935_v23 = vmul.f32 %v2467_v16, %v3330_v44 }
 0x9c2   :  { %v1379_v59 = vpop.f32.mrf.mxu1 }
 0x9c3   :  { %1975 = vrot.lane.b32.xlu0 %v1379_v59, %s2657_s21  ;;  %v1937_v37 = vsel %vm107_vm11, %v1935_v23, 0.0 }
 0x9c9   :  { %v2318_v27 = vpop.permute.xlu1 %2317 }
 0x9ca   :  { %v2319_v18 = vunpack.i.l.bf16 %v2318_v27  ;;  %v2320_v43 = vunpack.i.h.bf16 %v2318_v27 }
 0x9cc   :  { %1866 = vmatpush.msra.mxu2 %v2319_v18 }
 0x9ce   :  { %1867 = vmatpush.msra.mxu2 %v2320_v43 }
 0x9cf   :  { %2197 = vmatmul.msk.f32.vlgmr.msra.gmra.mxu2 %vm243_vm9, %v1838_v1 }
 0x9d0   :  { %v1281_v61 = vpop.f32.mrf.mxu2 }
 0x9d1   :  { %v2323_v6 = vpop.permute.xlu1 %2322 }
 0x9d2   :  { %v2324_v63 = vunpack.i.l.bf16 %v2323_v6  ;;  %v2325_v10 = vunpack.i.h.bf16 %v2323_v6 }
 0x9d3   :  { %v1382_v3 = vpop.f32.mrf.mxu1 }
 0x9d4   :  { %1977 = vrot.lane.b32.xlu1 %v1382_v3, %s2657_s21  ;;  %1964 = vmatpush.msra.mxu1 %v2324_v63 }
 0x9d6   :  { %1965 = vmatpush.msra.mxu1 %v2325_v10 }
 0x9d7   :  { %2198 = vmatmul.msk.f32.gmra.mxu2 %vm243_vm9, %v1839_v12  ;;  %2203 = vmatmul.msk.f32.vlgmr.msra.gmra.mxu1 %vm243_vm9, %v1936_v14 }
 0x9df   :  { %2204 = vmatmul.msk.f32.gmra.mxu1 %vm243_vm9, %v1937_v37 }
 0x9e1   :  { %v1284_v17 = vpop.f32.mrf.mxu2 }
 0x9f1   :  { %v1477_v29 = vpop.f32.mrf.mxu2 }
 0x9f9   :  { %v1575_v19 = vpop.f32.mrf.mxu1  ;;  %v1480_v44 = vpop.f32.mrf.mxu2 }
 0x9fa   :  { %1991 = vrot.lane.b32.xlu1 %v1575_v19, %s2661_s30 }
 0xa01   :  { %v1578_v20 = vpop.f32.mrf.mxu1 }
 0xa02   :  { %1993 = vrot.lane.b32.xlu1 %v1578_v20, %s2661_s30  ;;  %s3458_s30 = smov 28  }
 0xa09   :  { %v1771_v36 = vpop.f32.mrf.mxu1 }
 0xa0a   :  { %2007 = vrot.lane.b32.xlu0 %v1771_v36, %s2658_s5  ;;  %1983 = vrot.lane.b32.xlu1 %v1477_v29, %s3456_s3 }
 0xa12   :  { %1985 = vrot.lane.b32.xlu0 %v1480_v44, %s3456_s3 }
 0xa2f   :  { %v1673_v33 = vpop.f32.mrf.mxu2 }
 0xa30   :  { %1999 = vrot.lane.b32.xlu2 %v1673_v33, %s2630_s16 }
 0xa31   :  { %v1774_v47 = vpop.f32.mrf.mxu1 }
 0xa35   :  { %v1976_v11 = vpop.permute.xlu0 %1975 }
 0xa36   :  { %v2029_v2 = vsel %vm211_vm8, %v1281_v61, %v1976_v11 }
 0xa3f   :  { %v1676_v15 = vpop.f32.mrf.mxu2 }
 0xa40   :  { %2001 = vrot.lane.b32.xlu2 %v1676_v15, %s2630_s16  ;;  %s2662_s16 = smov [#allocation11]  }
 0xa41   :  { %s2085_s23 = sshll.u32 %s2662_s16, 4  ;;  %s2086_s23 = int_to_ptr.vmem [resolvable:$true] %s2085_s23 }
 0xa46   :  { %v1978_v38 = vpop.permute.xlu1 %1977 }
 0xa47   :  { %v2030_v56 = vsel %vm211_vm8, %v1284_v17, %v1978_v38 }
 0xa52   :  { %v1869_v21 = vpop.f32.mrf.mxu2 }
 0xa53   :  { %2015 = vrot.lane.b32.xlu1 %v1869_v21, %s3457_s29 }
 0xa54   :  { %v1967_v24 = vpop.f32.mrf.mxu1 }
 0xa55   :  { %2023 = vrot.lane.b32.xlu0 %v1967_v24, %s3458_s30 }
 0xa5a   :  { %v1872_v26 = vpop.f32.mrf.mxu2 }
 0xa5b   :  { %2017 = vrot.lane.b32.xlu1 %v1872_v26, %s3457_s29 }
 0xa5c   :  { %v1970_v4 = vpop.f32.mrf.mxu1 }
 0xa5d   :  { %2009 = vrot.lane.b32.xlu0 %v1774_v47, %s2658_s5  ;;  %2025 = vrot.lane.b32.xlu2 %v1970_v4, %s3458_s30 }
 0xa6c   :  { %v1992_v58 = vpop.permute.xlu1 %1991 }
 0xa74   :  { %v1994_v35 = vpop.permute.xlu1 %1993 }
 0xa7c   :  { %v2008_v53 = vpop.permute.xlu0 %2007  ;;  %v1984_v34 = vpop.permute.xlu1 %1983 }
 0xa7d   :  { %v2031_v8 = vsel %vm1047_vm12, %v2029_v2, %v1984_v34 }
 0xa7e   :  { %v2033_v22 = vsel %vm1050_vm13, %v2031_v8, %v1992_v58 }
 0xa84   :  { %v1986_v48 = vpop.permute.xlu0 %1985 }
 0xa85   :  { %v2032_v52 = vsel %vm1047_vm12, %v2030_v56, %v1986_v48 }
 0xa86   :  { %v2034_v51 = vsel %vm1050_vm13, %v2032_v52, %v1994_v35 }
 0xa8a   :  { %v2000_v57 = vpop.permute.xlu2 %1999 }
 0xa8b   :  { %v2035_v9 = vsel %vm243_vm9, %v2033_v22, %v2000_v57 }
 0xa8c   :  { %v2037_v45 = vsel %vm1055_vm14, %v2035_v9, %v2008_v53 }
 0xa9a   :  { %v2002_v39 = vpop.permute.xlu2 %2001 }
 0xa9b   :  { %v2036_v59 = vsel %vm243_vm9, %v2034_v51, %v2002_v39 }
 0xab7   :  { %v2026_v27 = vpop.permute.xlu2 %2025 }
 0xac5   :  { %v2016_v40 = vpop.permute.xlu1 %2015 }
 0xac6   :  { %v2039_v49 = vsel %vm1058_vm15, %v2037_v45, %v2016_v40 }
 0xac7   :  { %v2024_v7 = vpop.permute.xlu0 %2023 }
 0xac8   :  { %v2041_v42 = vsel %vm1061_vm1, %v2039_v49, %v2024_v7 }
 0xac9   :  { %2205 = vmatmul.msk.f32.vlgmr.msra.gmra.mxu3 %vm108_vm0, %v2041_v42 }
 0xacd   :  { %v2018_v50 = vpop.permute.xlu1 %2017 }
 0xacf   :  { %v2010_v5 = vpop.permute.xlu0 %2009 }
 0xad0   :  { %v2038_v31 = vsel %vm1055_vm14, %v2036_v59, %v2010_v5 }
 0xad1   :  { %v2040_v46 = vsel %vm1058_vm15, %v2038_v31, %v2018_v50 }
 0xad2   :  { %v2042_v18 = vsel %vm1061_vm1, %v2040_v46, %v2026_v27 }
 0xad3   :  { %2206 = vmatmul.msk.f32.gmra.mxu3 %vm108_vm0, %v2042_v18 }
 0xb4c   :  { %v2071_v43 = vpop.f32.mrf.mxu3 }
 0xb4d   :  { %v2077_v62 = vadd.f32 %v2071_v43, %v3093_v0 }
 0xb4f   :  { %2079 = vst.msk [vmem:[#allocation11] sm:$0xff] %vm108_vm0, %v2077_v62 }
 0xb56   :  { %v2074_v25 = vpop.f32.mrf.mxu3 }
 0xb57   :  { %v2078_v1 = vadd.f32 %v2074_v25, %v3097_v54 }
 0xb59   :  { %2080 = vst.msk [vmem:[#allocation11 + $0x8] sm:$0xff] %vm108_vm0, %v2078_v1 }
 0xb5a   :  { %2093 = dma.vmem_to_hbm [thread:$0]  %s2086_s23, 256, %s2088_s26, [#allocation4], %s3459_s27, %s3459_s27, %s3456_s3  }
 0xb5b   :  { %2622 = dma.done.wait [#allocation4], 256  }
 0xb5c   :  { %2623 = vsyncadd [#allocation4], 4294967040 }
 0xb5d   :  { %2098 = vsyncpa [#allocation3], 1 }
 0xb5e   :  { %2099 = vsyncpa [#allocation6], 1 }
 0xb5f   :  { %2100 = vsyncpa [#allocation9], 1 }
 0xb60   :  { %2101 = vsyncpa [#allocation4], 1 }

</bundles_post_ra>
